<compile_context>
chip_gen: v7x
topology: tpu7x:2x2x1
jax: 0.10.0
libtpu: 0.0.40
codegen_flags: <defaults>
</compile_context>

<pallas_src>
import numpy as np
import jax
import jax.numpy as jnp
from jax.experimental import pallas as pl
from jax.experimental.pallas import tpu as pltpu


# ---------------------------------------------------------------------------
# small helpers
# ---------------------------------------------------------------------------
def _round_up(x, m):
    return ((x + m - 1) // m) * m


def _nbytes(*arrays):
    return int(sum(a.size * a.dtype.itemsize for a in arrays))


def _largest_divisor_tile(total, per_unit_bytes, budget_bytes, unit=128):
    """Largest multiple of `unit` that divides `total` whose streamed footprint fits."""
    best = unit
    t = unit
    while t <= total:
        if total % t == 0 and t * per_unit_bytes <= budget_bytes:
            best = t
        t += unit
    return best


def _vmem_caps():
    """Generation-aware VMEM planning (v5e/v6e: 128 MiB/core, v7x: 64 MiB/core)."""
    try:
        cap = int(pltpu.get_tpu_info().vmem_capacity_bytes)
    except Exception:
        cap = 64 * 1024 * 1024                      # conservative default = v7x per-core VMEM
    budget = min(int(cap * 0.75), 88 * 1024 * 1024)  # what our tiling math may plan for
    limit = min(int(cap * 0.85), 100 * 1024 * 1024)  # scoped limit handed to Mosaic
    return budget, limit


# --- optional single-buffering of VMEM-resident operands ---------------------------
_SINGLE_BUFFER_OK = None


def _single_buffer_supported():
    """Probe whether BlockSpec(pipeline_mode=pl.Buffered(1)) is accepted by this jax
    build.  Resident (constant-index-map) operands are DMA'd only once, so single
    buffering them halves their VMEM footprint (most valuable on v7x's 64 MiB)."""
    global _SINGLE_BUFFER_OK
    if _SINGLE_BUFFER_OK is not None:
        return _SINGLE_BUFFER_OK

    def _copy(x_ref, o_ref):
        o_ref[...] = x_ref[...]

    try:
        spec = pl.BlockSpec((8, 128), lambda i: (0, 0), pipeline_mode=pl.Buffered(1))
        out = pl.pallas_call(
            _copy,
            out_shape=jax.ShapeDtypeStruct((8, 128), jnp.float32),
            grid=(1,),
            in_specs=[spec],
            out_specs=pl.BlockSpec((8, 128), lambda i: (0, 0)),
        )(jnp.zeros((8, 128), jnp.float32))
        jax.block_until_ready(out)
        _SINGLE_BUFFER_OK = True
    except Exception:
        _SINGLE_BUFFER_OK = False
    return _SINGLE_BUFFER_OK


def _const_spec(block_shape):
    """BlockSpec with a constant (all-zeros) index map: operand resident across grid."""
    return pl.BlockSpec(block_shape, lambda *_: (0,) * len(block_shape))


def _resident_spec(block_shape):
    """Resident operand spec; single-buffered when the jax build supports it."""
    if _single_buffer_supported():
        return pl.BlockSpec(block_shape, lambda *_: (0,) * len(block_shape),
                            pipeline_mode=pl.Buffered(1))
    return _const_spec(block_shape)


# ---------------------------------------------------------------------------
# kernel bodies
# ---------------------------------------------------------------------------
def _attention_context_gates(enc_ref, dec_ref, wa_dec_ref, wa_enc_ref, ba_ref,
                             v_ref, wih_ctx_ref, bih_ref, gi_ref):
    """Bahdanau attention + context, then initialize the GRU input-gate accumulator
    with the context/bias contribution (image contribution is streamed by the grid)."""
    Bp, S, Ep = enc_ref.shape
    Dp = dec_ref.shape[1]

    enc = enc_ref[...]                                            # (Bp,S,Ep) bf16
    dec_bf = dec_ref[...].astype(jnp.bfloat16)                    # (Bp,Dp)

    # energy = tanh(Wa [hidden ; enc] + ba); weights pre-transposed to (in, out).
    e_dec = jnp.dot(dec_bf, wa_dec_ref[...],
                    preferred_element_type=jnp.float32) + ba_ref[...]          # (Bp,Dp)
    e_enc = jnp.dot(enc.reshape(Bp * S, Ep), wa_enc_ref[...],
                    preferred_element_type=jnp.float32).reshape(Bp, S, Dp)
    energy = jnp.tanh(e_enc + e_dec[:, None, :])                               # (Bp,S,Dp) f32

    # score_{b,s} = energy[b,s,:] . v  -> VPU mul + XLU lane reduce
    # (no Bp separate 1xDp MXU matmuls; MXU stays free for the big GEMVs)
    score = jnp.sum(energy * v_ref[...][None, :, :], axis=-1, keepdims=True)   # (Bp,S,1)

    # softmax over source positions (f32); reciprocal runs on the EUP slot.
    score = score - jnp.max(score, axis=1, keepdims=True)
    p = jnp.exp(score)
    alpha = p * pl.reciprocal(jnp.sum(p, axis=1, keepdims=True), approx=True)  # (Bp,S,1)

    # ctx_{b,e} = sum_s alpha_{b,s} * enc_{b,s,e}  -> VPU mul + XLU sublane reduce
    ctx = jnp.sum(alpha * enc.astype(jnp.float32), axis=1)                     # (Bp,Ep) f32

    # GRU input gates: context contribution + bias (image part accumulated by grid).
    gi_ref[...] = jnp.dot(ctx.astype(jnp.bfloat16), wih_ctx_ref[...],
                          preferred_element_type=jnp.float32) + bih_ref[...]


def _gru_cell_finalize(dec_ref, whh_ref, bhh_ref, gi_ref):
    """PyTorch-gate-order (r,z,n) GRU cell update from the completed gi accumulator."""
    Dp = dec_ref.shape[1]
    dec = dec_ref[...]                                                         # f32
    gi = gi_ref[...]
    gh = jnp.dot(dec.astype(jnp.bfloat16), whh_ref[...],
                 preferred_element_type=jnp.float32) + bhh_ref[...]
    r = jax.nn.sigmoid(gi[:, 0 * Dp:1 * Dp] + gh[:, 0 * Dp:1 * Dp])
    z = jax.nn.sigmoid(gi[:, 1 * Dp:2 * Dp] + gh[:, 1 * Dp:2 * Dp])
    n = jnp.tanh(gi[:, 2 * Dp:3 * Dp] + r * gh[:, 2 * Dp:3 * Dp])
    return (1.0 - z) * n + z * dec


def gru_hidden_kernel(enc_ref, dec_ref, wa_dec_ref, wa_enc_ref, ba_ref, v_ref,
                      wih_ctx_ref, whh_ref, bih_ref, bhh_ref,
                      img_ref, wih_img_ref,
                      h_ref, hbf_ref, gi_ref):
    """Attention + GRU cell.  grid=(Pp//tk,): reduction over streamed image/weight tiles."""
    k = pl.program_id(0)

    @pl.when(k == 0)
    def _prologue():
        _attention_context_gates(enc_ref, dec_ref, wa_dec_ref, wa_enc_ref, ba_ref,
                                 v_ref, wih_ctx_ref, bih_ref, gi_ref)

    gi_ref[...] += jnp.dot(img_ref[...], wih_img_ref[...],
                           preferred_element_type=jnp.float32)

    @pl.when(k == pl.num_programs(0) - 1)
    def _finalize():
        h = _gru_cell_finalize(dec_ref, whh_ref, bhh_ref, gi_ref)
        h_ref[...] = h
        hbf_ref[...] = h.astype(jnp.bfloat16)   # bf16 copy for fsout (cast exactly once)


def fused_decoder_kernel(enc_ref, dec_ref, wa_dec_ref, wa_enc_ref, ba_ref, v_ref,
                         wih_ctx_ref, whh_ref, bih_ref, bhh_ref,
                         wout_ref, bout_ref,
                         img_ref, wih_img_ref,
                         h_ref, out_ref, gi_ref):
    """Attention + GRU cell + fsout in one kernel (wout VMEM-resident)."""
    k = pl.program_id(0)

    @pl.when(k == 0)
    def _prologue():
        _attention_context_gates(enc_ref, dec_ref, wa_dec_ref, wa_enc_ref, ba_ref,
                                 v_ref, wih_ctx_ref, bih_ref, gi_ref)

    gi_ref[...] += jnp.dot(img_ref[...], wih_img_ref[...],
                           preferred_element_type=jnp.float32)

    @pl.when(k == pl.num_programs(0) - 1)
    def _finalize():
        h = _gru_cell_finalize(dec_ref, whh_ref, bhh_ref, gi_ref)
        h_ref[...] = h
        out_ref[...] = (jnp.dot(h.astype(jnp.bfloat16), wout_ref[...],
                                preferred_element_type=jnp.float32) + bout_ref[...])


def fsout_kernel(h_ref, wout_ref, bout_ref, out_ref):
    """fsout projection, tiled over the (padded) output dim Pp ('parallel' axis).
    h is already bf16 (cast once in kernel 1's finalize) -> no per-step cast here."""
    out_ref[...] = jnp.dot(h_ref[...], wout_ref[...],
                           preferred_element_type=jnp.float32) + bout_ref[...]


# ---------------------------------------------------------------------------
# one-time weight layout preparation (hoisted out of the per-step hot path)
# ---------------------------------------------------------------------------
def prepare_params(params):
    """Pre-transpose weights to (in, out), pad to lane/sublane multiples, cast matmul
    weights to bf16.  Call ONCE and reuse the result for every decoder_forward call."""
    f32, bf16 = jnp.float32, jnp.bfloat16
    D = params["wa"].shape[0]
    E = params["wa"].shape[1] - D
    P = params["w_ih"].shape[1] - E

    Dp, Ep, Pp = _round_up(D, 128), _round_up(E, 128), _round_up(P, 128)

    def pad2(x, r, c):
        return jnp.pad(x, ((0, r - x.shape[0]), (0, c - x.shape[1])))

    # attention: wa is (D, D+E), torch.cat order [hidden ; encoder_outputs]
    wa = params["wa"].astype(f32)
    wa_dec_t = pad2(wa[:, :D].T, Dp, Dp).astype(bf16)                 # (Dp, Dp)
    wa_enc_t = pad2(wa[:, D:].T, Ep, Dp).astype(bf16)                 # (Ep, Dp)
    ba = jnp.pad(params["ba"].astype(f32), (0, Dp - D)).reshape(1, Dp)
    v = jnp.pad(params["v"].astype(f32), (0, Dp - D)).reshape(1, Dp)  # f32: VPU score path

    # GRU: w_ih is (3D, P+E), torch.cat order [image ; context]; gate order r,z,n
    def pad_gate_rows(w):                                             # (3D,K)->(3Dp,K) per-gate
        return jnp.concatenate(
            [jnp.pad(w[g * D:(g + 1) * D, :], ((0, Dp - D), (0, 0))) for g in range(3)],
            axis=0)

    def pad_gate_vec(b):                                              # (3D,)->(1,3Dp) per-gate
        return jnp.concatenate(
            [jnp.pad(b[g * D:(g + 1) * D], (0, Dp - D)) for g in range(3)]).reshape(1, 3 * Dp)

    w_ih = pad_gate_rows(params["w_ih"].astype(f32))
    prepped = {
        "dims": (D, E, P, Dp, Ep, Pp),
        "wa_dec_t": wa_dec_t,
        "wa_enc_t": wa_enc_t,
        "ba": ba,
        "v": v,
        "wih_img_t": pad2(w_ih[:, :P].T, Pp, 3 * Dp).astype(bf16),    # (Pp, 3Dp)
        "wih_ctx_t": pad2(w_ih[:, P:].T, Ep, 3 * Dp).astype(bf16),    # (Ep, 3Dp)
        "whh_t": pad2(pad_gate_rows(params["w_hh"].astype(f32)).T, Dp, 3 * Dp).astype(bf16),
        "bih": pad_gate_vec(params["b_ih"].astype(f32)),
        "bhh": pad_gate_vec(params["b_hh"].astype(f32)),
        "wout_t": pad2(params["w_out"].astype(f32).T, Dp, Pp).astype(bf16),   # (Dp, Pp)
        "bout": jnp.pad(params["b_out"].astype(f32), (0, Pp - P)).reshape(1, Pp),
    }
    jax.block_until_ready([x for x in prepped.values() if isinstance(x, jax.Array)])
    return prepped


# ---------------------------------------------------------------------------
# forward wrapper
# ---------------------------------------------------------------------------
def decoder_forward(prepped, image, encoder_outputs, decoder_input):
    f32, bf16 = jnp.float32, jnp.bfloat16
    D, E, P, Dp, Ep, Pp = prepped["dims"]

    B = image.shape[0]
    S = encoder_outputs.shape[1]
    Bp = _round_up(B, 8)

    # ---- per-step activations (batch -> 8 sublanes, features -> 128 lanes) ----
    img = image.reshape(B, -1).astype(f32)
    img_p = jnp.pad(img, ((0, Bp - B), (0, Pp - P))).astype(bf16)
    enc_p = jnp.pad(encoder_outputs.astype(f32),
                    ((0, Bp - B), (0, 0), (0, Ep - E))).astype(bf16)
    dec_p = jnp.pad(decoder_input.astype(f32), ((0, Bp - B), (0, Dp - D)))

    budget, vmem_limit = _vmem_caps()

    # resident (constant-index-map) operands for the attention + GRU kernel
    resident = [
        (enc_p,                (Bp, S, Ep)),
        (dec_p,                (Bp, Dp)),
        (prepped["wa_dec_t"],  (Dp, Dp)),
        (prepped["wa_enc_t"],  (Ep, Dp)),
        (prepped["ba"],        (1, Dp)),
        (prepped["v"],         (1, Dp)),
        (prepped["wih_ctx_t"], (Ep, 3 * Dp)),
        (prepped["whh_t"],     (Dp, 3 * Dp)),
        (prepped["bih"],       (1, 3 * Dp)),
        (prepped["bhh"],       (1, 3 * Dp)),
    ]
    resident_arrays = [a for a, _ in resident]
    resident_specs = [_resident_spec(s) for _, s in resident]
    resident_bytes = _nbytes(*resident_arrays)
    buf = 1 if _single_buffer_supported() else 2        # resident input buffer count
    acc_bytes = Bp * 3 * Dp * 4                          # gi accumulator scratch
    # streamed bytes per column of Pp (img column + w_ih row), bf16, double-buffered
    per_col = 2 * 2 * (Bp + 3 * Dp)

    attn_flops = 2 * Bp * (Dp * Dp + S * Ep * Dp + S * Dp + S * Ep)
    gru_flops = 2 * Bp * (Ep * 3 * Dp + Pp * 3 * Dp + Dp * 3 * Dp)
    fsout_flops = 2 * Bp * Dp * Pp
    trans = Bp * (S * Dp + S + 3 * Dp)

    # ---- decide whether fsout can be folded into kernel 1 (wout fully resident) ----
    wout_bytes = _nbytes(prepped["wout_t"], prepped["bout"])
    fused_fixed = (buf * (resident_bytes + wout_bytes)
                   + 2 * (Bp * Dp * 4 + Bp * Pp * 4)     # h + out output buffers
                   + acc_bytes)
    fuse_fsout = (fused_fixed + per_col * 128) <= budget

    if fuse_fsout:
        tk = _largest_divisor_tile(Pp, per_col, budget - fused_fixed)
        nk = Pp // tk
        in_arrays = resident_arrays + [prepped["wout_t"], prepped["bout"],
                                       img_p, prepped["wih_img_t"]]
        in_specs = (resident_specs
                    + [_resident_spec((Dp, Pp)), _resident_spec((1, Pp)),
                       pl.BlockSpec((Bp, tk), lambda k: (0, k)),
                       pl.BlockSpec((tk, 3 * Dp), lambda k: (k, 0))])
        h_pad, out_pad = pl.pallas_call(
            fused_decoder_kernel,
            out_shape=(jax.ShapeDtypeStruct((Bp, Dp), f32),
                       jax.ShapeDtypeStruct((Bp, Pp), f32)),
            grid=(nk,),
            in_specs=in_specs,
            out_specs=[_const_spec((Bp, Dp)), _const_spec((Bp, Pp))],
            scratch_shapes=[pltpu.VMEM((Bp, 3 * Dp), f32)],
            compiler_params=pltpu.CompilerParams(
                dimension_semantics=("arbitrary",),
                vmem_limit_bytes=vmem_limit),
            cost_estimate=pl.CostEstimate(
                flops=int(attn_flops + gru_flops + fsout_flops),
                transcendentals=int(trans),
                bytes_accessed=int(_nbytes(*in_arrays) + Bp * Dp * 4 + Bp * Pp * 4)),
        )(*in_arrays)
    else:
        # -------------------- kernel 1: attention + GRU cell --------------------
        fixed1 = buf * resident_bytes + 2 * (Bp * Dp * 4 + Bp * Dp * 2) + acc_bytes
        tk = _largest_divisor_tile(Pp, per_col, budget - fixed1)
        nk = Pp // tk
        in_arrays = resident_arrays + [img_p, prepped["wih_img_t"]]
        in_specs = (resident_specs
                    + [pl.BlockSpec((Bp, tk), lambda k: (0, k)),
                       pl.BlockSpec((tk, 3 * Dp), lambda k: (k, 0))])
        h_pad, h_bf16 = pl.pallas_call(
            gru_hidden_kernel,
            out_shape=(jax.ShapeDtypeStruct((Bp, Dp), f32),
                       jax.ShapeDtypeStruct((Bp, Dp), bf16)),
            grid=(nk,),
            in_specs=in_specs,
            out_specs=[_const_spec((Bp, Dp)), _const_spec((Bp, Dp))],
            scratch_shapes=[pltpu.VMEM((Bp, 3 * Dp), f32)],
            compiler_params=pltpu.CompilerParams(
                dimension_semantics=("arbitrary",),
                vmem_limit_bytes=vmem_limit),
            cost_estimate=pl.CostEstimate(
                flops=int(attn_flops + gru_flops),
                transcendentals=int(trans),
                bytes_accessed=int(_nbytes(*in_arrays) + Bp * Dp * 6)),
        )(*in_arrays)

        # -------------------- kernel 2: fsout projection --------------------
        fixed2 = 2 * Bp * Dp * 2
        per_col2 = 2 * (Dp * 2 + 4 + Bp * 4)
        tp = _largest_divisor_tile(Pp, per_col2, budget - fixed2)
        ntiles = Pp // tp
        out_pad = pl.pallas_call(
            fsout_kernel,
            out_shape=jax.ShapeDtypeStruct((Bp, Pp), f32),
            grid=(ntiles,),
            in_specs=[
                _resident_spec((Bp, Dp)),                     # h (bf16): resident
                pl.BlockSpec((Dp, tp), lambda j: (0, j)),     # w_out^T tile (streamed)
                pl.BlockSpec((1, tp), lambda j: (0, j)),      # b_out tile
            ],
            out_specs=pl.BlockSpec((Bp, tp), lambda j: (0, j)),
            compiler_params=pltpu.CompilerParams(
                dimension_semantics=("parallel",),
                vmem_limit_bytes=vmem_limit),
            cost_estimate=pl.CostEstimate(
                flops=int(fsout_flops), transcendentals=0,
                bytes_accessed=int(_nbytes(h_bf16, prepped["wout_t"], prepped["bout"])
                                   + Bp * Pp * 4)),
        )(h_bf16, prepped["wout_t"], prepped["bout"])

    return out_pad[:B, :P], h_pad[:B, :D]


# ---------------------------------------------------------------------------
# Pure-JAX f32 reference (mirrors the PyTorch forward exactly)
# ---------------------------------------------------------------------------
def decoder_reference(params, image, encoder_outputs, decoder_input):
    B = image.shape[0]
    img = image.reshape(B, -1)
    D = decoder_input.shape[1]

    wa = params["wa"]
    wa_dec, wa_enc = wa[:, :D], wa[:, D:]
    e = jnp.tanh(jnp.einsum("bd,kd->bk", decoder_input, wa_dec)[:, None, :]
                 + jnp.einsum("bse,ke->bsk", encoder_outputs, wa_enc)
                 + params["ba"][None, None, :])
    score = jnp.einsum("bsk,k->bs", e, params["v"])
    alpha = jax.nn.softmax(score, axis=1)
    ctx = jnp.einsum("bs,bse->be", alpha, encoder_outputs)

    x = jnp.concatenate([img, ctx], axis=1)
    gi = x @ params["w_ih"].T + params["b_ih"]
    gh = decoder_input @ params["w_hh"].T + params["b_hh"]
    r = jax.nn.sigmoid(gi[:, :D] + gh[:, :D])
    z = jax.nn.sigmoid(gi[:, D:2 * D] + gh[:, D:2 * D])
    n = jnp.tanh(gi[:, 2 * D:] + r * gh[:, 2 * D:])
    h = (1.0 - z) * n + z * decoder_input
    out = h @ params["w_out"].T + params["b_out"]
    return out, h


# ---------------------------------------------------------------------------
def init_params(key, encoder_hidden_dim, decoder_dim, image_dim):
    E = 2 * encoder_hidden_dim
    P = image_dim * image_dim
    D = decoder_dim
    ks = jax.random.split(key, 9)

    def u(k, shape, fan_in):
        b = 1.0 / np.sqrt(fan_in)
        return jax.random.uniform(k, shape, jnp.float32, -b, b)

    return {
        "wa":    u(ks[0], (D, D + E), D + E),    # attention Linear weight
        "ba":    u(ks[1], (D,),       D + E),    # attention Linear bias
        "v":     u(ks[2], (D,),       D),        # attention scoring vector
        "w_ih":  u(ks[3], (3 * D, P + E), D),    # GRU input->hidden weights (r,z,n)
        "w_hh":  u(ks[4], (3 * D, D),     D),    # GRU hidden->hidden weights
        "b_ih":  u(ks[5], (3 * D,),       D),
        "b_hh":  u(ks[6], (3 * D,),       D),
        "w_out": u(ks[7], (P, D),         D),    # fsout Linear
        "b_out": u(ks[8], (P,),           D),
    }


if __name__ == "__main__":
    B = 2
    encoder_hidden_dim = 16      # E = 32
    decoder_dim = 32             # D
    image_dim = 4                # P = 16
    S = 8                        # encoder sequence length

    key = jax.random.PRNGKey(0)
    k_img, k_enc, k_dec, k_par = jax.random.split(key, 4)

    image = jax.random.normal(k_img, (B, image_dim, image_dim), jnp.float32)
    encoder_outputs = jax.random.normal(k_enc, (B, S, 2 * encoder_hidden_dim), jnp.float32)
    decoder_input = jax.random.normal(k_dec, (B, decoder_dim), jnp.float32)

    params = init_params(k_par, encoder_hidden_dim, decoder_dim, image_dim)
    prepped = prepare_params(params)          # one-time weight layout prep (off hot path)

    out, hidden = decoder_forward(prepped, image, encoder_outputs, decoder_input)
    jax.block_until_ready((out, hidden))

    out_ref, hidden_ref = decoder_reference(params, image, encoder_outputs, decoder_input)
    # bf16 matmul operands + approx softmax reciprocal -> looser tolerance than pure f32
    np.testing.assert_allclose(np.asarray(out), np.asarray(out_ref), atol=5e-2, rtol=5e-2)
    np.testing.assert_allclose(np.asarray(hidden), np.asarray(hidden_ref), atol=5e-2, rtol=5e-2)

    print("KERNEL_OK")
</pallas_src>

<mosaic_0001>
module attributes {stable_mosaic.version = 11 : i64} {
  func.func @_copy(%arg0: i32, %arg1: memref<8x128xf32, #tpu.memory_space<vmem>>, %arg2: memref<8x128xf32, #tpu.memory_space<vmem>>) attributes {dimension_semantics = [#tpu.dimension_semantics<arbitrary>], iteration_bounds = array<i64: 1>, scalar_prefetch = 0 : i64, scratch_operands = 0 : i64, tpu.core_type = #tpu.core_type<tc>, window_params = [{pipeline_mode = #tpu.pipeline_mode<synchronous>, transform_indices = @transform_0, window_bounds = array<i64: 8, 128>}, {pipeline_mode = #tpu.pipeline_mode<synchronous>, transform_indices = @transform_1, window_bounds = array<i64: 8, 128>}]} {
    %c0 = arith.constant 0 : index
    %c0_0 = arith.constant 0 : index
    %0 = vector.load %arg1[%c0, %c0_0] : memref<8x128xf32, #tpu.memory_space<vmem>>, vector<8x128xf32>
    %c0_1 = arith.constant 0 : index
    %c0_2 = arith.constant 0 : index
    %1 = vector.load %arg2[%c0_1, %c0_2] : memref<8x128xf32, #tpu.memory_space<vmem>>, vector<8x128xf32>
    tpu.vector_store %arg2[%c0_1, %c0_2], %0 {strides = array<i32>} : memref<8x128xf32, #tpu.memory_space<vmem>>, vector<8x128xf32>,
    return
  }
  func.func @transform_0(%arg0: i32) -> (i32, i32) {
    %c0_i32 = arith.constant 0 : i32
    %c0_i32_0 = arith.constant 0 : i32
    %c0_i32_1 = arith.constant 0 : i32
    return %c0_i32, %c0_i32_0 : i32, i32
  }
  func.func @transform_1(%arg0: i32) -> (i32, i32) {
    %c0_i32 = arith.constant 0 : i32
    %c0_i32_0 = arith.constant 0 : i32
    %c0_i32_1 = arith.constant 0 : i32
    return %c0_i32, %c0_i32_0 : i32, i32
  }
}

module attributes {stable_mosaic.version = 11 : i64} {
  func.func @fused_decoder_kernel(%arg0: i32, %arg1: memref<8x8x128xbf16, #tpu.memory_space<vmem>>, %arg2: memref<8x128xf32, #tpu.memory_space<vmem>>, %arg3: memref<128x128xbf16, #tpu.memory_space<vmem>>, %arg4: memref<128x128xbf16, #tpu.memory_space<vmem>>, %arg5: memref<1x128xf32, #tpu.memory_space<vmem>>, %arg6: memref<1x128xf32, #tpu.memory_space<vmem>>, %arg7: memref<128x384xbf16, #tpu.memory_space<vmem>>, %arg8: memref<128x384xbf16, #tpu.memory_space<vmem>>, %arg9: memref<1x384xf32, #tpu.memory_space<vmem>>, %arg10: memref<1x384xf32, #tpu.memory_space<vmem>>, %arg11: memref<128x128xbf16, #tpu.memory_space<vmem>>, %arg12: memref<1x128xf32, #tpu.memory_space<vmem>>, %arg13: memref<8x128xbf16, #tpu.memory_space<vmem>>, %arg14: memref<128x384xbf16, #tpu.memory_space<vmem>>, %arg15: memref<8x128xf32, #tpu.memory_space<vmem>>, %arg16: memref<8x128xf32, #tpu.memory_space<vmem>>, %arg17: memref<8x384xf32, #tpu.memory_space<vmem>>) attributes {dimension_semantics = [#tpu.dimension_semantics<arbitrary>], iteration_bounds = array<i64: 1>, scalar_prefetch = 0 : i64, scratch_operands = 1 : i64, tpu.core_type = #tpu.core_type<tc>, window_params = [{pipeline_mode = #tpu.pipeline_mode<synchronous>, transform_indices = @transform_0, window_bounds = array<i64: 8, 8, 128>}, {pipeline_mode = #tpu.pipeline_mode<synchronous>, transform_indices = @transform_1, window_bounds = array<i64: 8, 128>}, {pipeline_mode = #tpu.pipeline_mode<synchronous>, transform_indices = @transform_2, window_bounds = array<i64: 128, 128>}, {pipeline_mode = #tpu.pipeline_mode<synchronous>, transform_indices = @transform_3, window_bounds = array<i64: 128, 128>}, {pipeline_mode = #tpu.pipeline_mode<synchronous>, transform_indices = @transform_4, window_bounds = array<i64: 1, 128>}, {pipeline_mode = #tpu.pipeline_mode<synchronous>, transform_indices = @transform_5, window_bounds = array<i64: 1, 128>}, {pipeline_mode = #tpu.pipeline_mode<synchronous>, transform_indices = @transform_6, window_bounds = array<i64: 128, 384>}, {pipeline_mode = #tpu.pipeline_mode<synchronous>, transform_indices = @transform_7, window_bounds = array<i64: 128, 384>}, {pipeline_mode = #tpu.pipeline_mode<synchronous>, transform_indices = @transform_8, window_bounds = array<i64: 1, 384>}, {pipeline_mode = #tpu.pipeline_mode<synchronous>, transform_indices = @transform_9, window_bounds = array<i64: 1, 384>}, {pipeline_mode = #tpu.pipeline_mode<synchronous>, transform_indices = @transform_10, window_bounds = array<i64: 128, 128>}, {pipeline_mode = #tpu.pipeline_mode<synchronous>, transform_indices = @transform_11, window_bounds = array<i64: 1, 128>}, {transform_indices = @transform_12, window_bounds = array<i64: 8, 128>}, {transform_indices = @transform_13, window_bounds = array<i64: 128, 384>}, {pipeline_mode = #tpu.pipeline_mode<synchronous>, transform_indices = @transform_14, window_bounds = array<i64: 8, 128>}, {pipeline_mode = #tpu.pipeline_mode<synchronous>, transform_indices = @transform_15, window_bounds = array<i64: 8, 128>}]} {
    %c0_i32 = arith.constant 0 : i32
    %0 = arith.cmpi eq, %arg0, %c0_i32 : i32
    %1 = arith.extui %0 : i1 to i32
    %c0_i32_0 = arith.constant 0 : i32
    %2 = arith.cmpi ne, %1, %c0_i32_0 : i32
    scf.if %2 {
      %c0_10 = arith.constant 0 : index
      %c0_11 = arith.constant 0 : index
      %c0_12 = arith.constant 0 : index
      %12 = vector.load %arg1[%c0_10, %c0_11, %c0_12] : memref<8x8x128xbf16, #tpu.memory_space<vmem>>, vector<8x8x128xbf16>
      %c0_13 = arith.constant 0 : index
      %c0_14 = arith.constant 0 : index
      %13 = vector.load %arg2[%c0_13, %c0_14] : memref<8x128xf32, #tpu.memory_space<vmem>>, vector<8x128xf32>
      %14 = arith.truncf %13 : vector<8x128xf32> to vector<8x128xbf16>
      %c0_15 = arith.constant 0 : index
      %c0_16 = arith.constant 0 : index
      %15 = vector.load %arg3[%c0_15, %c0_16] : memref<128x128xbf16, #tpu.memory_space<vmem>>, vector<128x128xbf16>
      %cst_17 = arith.constant dense<0.000000e+00> : vector<8x128xf32>
      %16 = tpu.matmul %14, %15, %cst_17 {dimension_numbers = #tpu.dot_dimension_numbers<[1], [0], [0], [1], [0, 0, 1, 1], [], []>} : vector<8x128xbf16>, vector<128x128xbf16>, vector<8x128xf32> -> vector<8x128xf32>
      %c0_18 = arith.constant 0 : index
      %c0_19 = arith.constant 0 : index
      %17 = vector.load %arg5[%c0_18, %c0_19] : memref<1x128xf32, #tpu.memory_space<vmem>>, vector<1x128xf32>
      %18 = vector.broadcast %17 : vector<1x128xf32> to vector<8x128xf32>
      %19 = arith.addf %16, %18 : vector<8x128xf32>
      %20 = vector.shape_cast %12 : vector<8x8x128xbf16> to vector<64x128xbf16>
      %c0_20 = arith.constant 0 : index
      %c0_21 = arith.constant 0 : index
      %21 = vector.load %arg4[%c0_20, %c0_21] : memref<128x128xbf16, #tpu.memory_space<vmem>>, vector<128x128xbf16>
      %cst_22 = arith.constant dense<0.000000e+00> : vector<64x128xf32>
      %22 = tpu.matmul %20, %21, %cst_22 {dimension_numbers = #tpu.dot_dimension_numbers<[1], [0], [0], [1], [0, 0, 1, 1], [], []>} : vector<64x128xbf16>, vector<128x128xbf16>, vector<64x128xf32> -> vector<64x128xf32>
      %23 = vector.shape_cast %22 : vector<64x128xf32> to vector<8x8x128xf32>
      %24 = vector.shape_cast %19 : vector<8x128xf32> to vector<8x1x128xf32>
      %25 = vector.broadcast %24 : vector<8x1x128xf32> to vector<8x8x128xf32>
      %26 = arith.addf %23, %25 : vector<8x8x128xf32>
      %27 = math.tanh %26 : vector<8x8x128xf32>
      %c0_23 = arith.constant 0 : index
      %c0_24 = arith.constant 0 : index
      %28 = vector.load %arg6[%c0_23, %c0_24] : memref<1x128xf32, #tpu.memory_space<vmem>>, vector<1x128xf32>
      %29 = vector.shape_cast %28 : vector<1x128xf32> to vector<1x1x128xf32>
      %30 = vector.broadcast %29 : vector<1x1x128xf32> to vector<8x8x128xf32>
      %31 = arith.mulf %27, %30 : vector<8x8x128xf32>
      %cst_25 = arith.constant dense<0.000000e+00> : vector<8x8xf32>
      %32 = vector.multi_reduction <add>, %31, %cst_25 [2] : vector<8x8x128xf32> to vector<8x8xf32>
      %33 = vector.shape_cast %32 : vector<8x8xf32> to vector<8x8x1xf32>
      %cst_26 = arith.constant dense<0xFF800000> : vector<8x1xf32>
      %34 = vector.multi_reduction <maximumf>, %33, %cst_26 [1] : vector<8x8x1xf32> to vector<8x1xf32>
      %35 = vector.shape_cast %34 : vector<8x1xf32> to vector<8x1x1xf32>
      %36 = vector.broadcast %35 : vector<8x1x1xf32> to vector<8x8x1xf32>
      %37 = arith.subf %33, %36 : vector<8x8x1xf32>
      %38 = math.exp %37 : vector<8x8x1xf32>
      %cst_27 = arith.constant dense<0.000000e+00> : vector<8x1xf32>
      %39 = vector.multi_reduction <add>, %38, %cst_27 [1] : vector<8x8x1xf32> to vector<8x1xf32>
      %40 = vector.shape_cast %39 : vector<8x1xf32> to vector<8x1x1xf32>
      %41 = tpu.reciprocal %40 {approx = true} : vector<8x1x1xf32> -> vector<8x1x1xf32>
      %42 = vector.broadcast %41 : vector<8x1x1xf32> to vector<8x8x1xf32>
      %43 = arith.mulf %38, %42 : vector<8x8x1xf32>
      %44 = arith.extf %12 : vector<8x8x128xbf16> to vector<8x8x128xf32>
      %45 = vector.broadcast %43 : vector<8x8x1xf32> to vector<8x8x128xf32>
      %46 = arith.mulf %45, %44 : vector<8x8x128xf32>
      %cst_28 = arith.constant dense<0.000000e+00> : vector<8x128xf32>
      %47 = vector.multi_reduction <add>, %46, %cst_28 [1] : vector<8x8x128xf32> to vector<8x128xf32>
      %48 = arith.truncf %47 : vector<8x128xf32> to vector<8x128xbf16>
      %c0_29 = arith.constant 0 : index
      %c0_30 = arith.constant 0 : index
      %49 = vector.load %arg7[%c0_29, %c0_30] : memref<128x384xbf16, #tpu.memory_space<vmem>>, vector<128x384xbf16>
      %cst_31 = arith.constant dense<0.000000e+00> : vector<8x384xf32>
      %50 = tpu.matmul %48, %49, %cst_31 {dimension_numbers = #tpu.dot_dimension_numbers<[1], [0], [0], [1], [0, 0, 1, 1], [], []>} : vector<8x128xbf16>, vector<128x384xbf16>, vector<8x384xf32> -> vector<8x384xf32>
      %c0_32 = arith.constant 0 : index
      %c0_33 = arith.constant 0 : index
      %51 = vector.load %arg9[%c0_32, %c0_33] : memref<1x384xf32, #tpu.memory_space<vmem>>, vector<1x384xf32>
      %52 = vector.broadcast %51 : vector<1x384xf32> to vector<8x384xf32>
      %53 = arith.addf %50, %52 : vector<8x384xf32>
      %c0_34 = arith.constant 0 : index
      %c0_35 = arith.constant 0 : index
      %54 = vector.load %arg17[%c0_34, %c0_35] : memref<8x384xf32, #tpu.memory_space<vmem>>, vector<8x384xf32>
      tpu.vector_store %arg17[%c0_34, %c0_35], %53 {strides = array<i32>} : memref<8x384xf32, #tpu.memory_space<vmem>>, vector<8x384xf32>,
    } else {
    }
    %c0 = arith.constant 0 : index
    %c0_1 = arith.constant 0 : index
    %3 = vector.load %arg17[%c0, %c0_1] : memref<8x384xf32, #tpu.memory_space<vmem>>, vector<8x384xf32>
    %c0_2 = arith.constant 0 : index
    %c0_3 = arith.constant 0 : index
    %4 = vector.load %arg13[%c0_2, %c0_3] : memref<8x128xbf16, #tpu.memory_space<vmem>>, vector<8x128xbf16>
    %c0_4 = arith.constant 0 : index
    %c0_5 = arith.constant 0 : index
    %5 = vector.load %arg14[%c0_4, %c0_5] : memref<128x384xbf16, #tpu.memory_space<vmem>>, vector<128x384xbf16>
    %cst = arith.constant dense<0.000000e+00> : vector<8x384xf32>
    %6 = tpu.matmul %4, %5, %cst {dimension_numbers = #tpu.dot_dimension_numbers<[1], [0], [0], [1], [0, 0, 1, 1], [], []>} : vector<8x128xbf16>, vector<128x384xbf16>, vector<8x384xf32> -> vector<8x384xf32>
    %7 = arith.addf %3, %6 : vector<8x384xf32>
    %c0_6 = arith.constant 0 : index
    %c0_7 = arith.constant 0 : index
    %8 = vector.load %arg17[%c0_6, %c0_7] : memref<8x384xf32, #tpu.memory_space<vmem>>, vector<8x384xf32>
    tpu.vector_store %arg17[%c0_6, %c0_7], %7 {strides = array<i32>} : memref<8x384xf32, #tpu.memory_space<vmem>>, vector<8x384xf32>,
    %c0_i32_8 = arith.constant 0 : i32
    %9 = arith.cmpi eq, %arg0, %c0_i32_8 : i32
    %10 = arith.extui %9 : i1 to i32
    %c0_i32_9 = arith.constant 0 : i32
    %11 = arith.cmpi ne, %10, %c0_i32_9 : i32
    scf.if %11 {
      %c0_10 = arith.constant 0 : index
      %c0_11 = arith.constant 0 : index
      %12 = vector.load %arg2[%c0_10, %c0_11] : memref<8x128xf32, #tpu.memory_space<vmem>>, vector<8x128xf32>
      %c0_12 = arith.constant 0 : index
      %c0_13 = arith.constant 0 : index
      %13 = vector.load %arg17[%c0_12, %c0_13] : memref<8x384xf32, #tpu.memory_space<vmem>>, vector<8x384xf32>
      %14 = arith.truncf %12 : vector<8x128xf32> to vector<8x128xbf16>
      %c0_14 = arith.constant 0 : index
      %c0_15 = arith.constant 0 : index
      %15 = vector.load %arg8[%c0_14, %c0_15] : memref<128x384xbf16, #tpu.memory_space<vmem>>, vector<128x384xbf16>
      %cst_16 = arith.constant dense<0.000000e+00> : vector<8x384xf32>
      %16 = tpu.matmul %14, %15, %cst_16 {dimension_numbers = #tpu.dot_dimension_numbers<[1], [0], [0], [1], [0, 0, 1, 1], [], []>} : vector<8x128xbf16>, vector<128x384xbf16>, vector<8x384xf32> -> vector<8x384xf32>
      %c0_17 = arith.constant 0 : index
      %c0_18 = arith.constant 0 : index
      %17 = vector.load %arg10[%c0_17, %c0_18] : memref<1x384xf32, #tpu.memory_space<vmem>>, vector<1x384xf32>
      %18 = vector.broadcast %17 : vector<1x384xf32> to vector<8x384xf32>
      %19 = arith.addf %16, %18 : vector<8x384xf32>
      %20 = vector.extract_strided_slice %13 {offsets = [0, 0], sizes = [8, 128], strides = [1, 1]} : vector<8x384xf32> to vector<8x128xf32>
      %21 = vector.extract_strided_slice %19 {offsets = [0, 0], sizes = [8, 128], strides = [1, 1]} : vector<8x384xf32> to vector<8x128xf32>
      %22 = arith.addf %20, %21 : vector<8x128xf32>
      %23 = arith.negf %22 : vector<8x128xf32>
      %24 = math.exp %23 : vector<8x128xf32>
      %cst_19 = arith.constant 1.000000e+00 : f32
      %25 = vector.broadcast %cst_19 : f32 to vector<8x128xf32>
      %26 = arith.addf %25, %24 : vector<8x128xf32>
      %27 = arith.divf %25, %26 : vector<8x128xf32>
      %28 = vector.extract_strided_slice %13 {offsets = [0, 128], sizes = [8, 128], strides = [1, 1]} : vector<8x384xf32> to vector<8x128xf32>
      %29 = vector.extract_strided_slice %19 {offsets = [0, 128], sizes = [8, 128], strides = [1, 1]} : vector<8x384xf32> to vector<8x128xf32>
      %30 = arith.addf %28, %29 : vector<8x128xf32>
      %31 = arith.negf %30 : vector<8x128xf32>
      %32 = math.exp %31 : vector<8x128xf32>
      %cst_20 = arith.constant 1.000000e+00 : f32
      %33 = vector.broadcast %cst_20 : f32 to vector<8x128xf32>
      %34 = arith.addf %33, %32 : vector<8x128xf32>
      %35 = arith.divf %33, %34 : vector<8x128xf32>
      %36 = vector.extract_strided_slice %13 {offsets = [0, 256], sizes = [8, 128], strides = [1, 1]} : vector<8x384xf32> to vector<8x128xf32>
      %37 = vector.extract_strided_slice %19 {offsets = [0, 256], sizes = [8, 128], strides = [1, 1]} : vector<8x384xf32> to vector<8x128xf32>
      %38 = arith.mulf %27, %37 : vector<8x128xf32>
      %39 = arith.addf %36, %38 : vector<8x128xf32>
      %40 = math.tanh %39 : vector<8x128xf32>
      %cst_21 = arith.constant 1.000000e+00 : f32
      %41 = vector.broadcast %cst_21 : f32 to vector<8x128xf32>
      %42 = arith.subf %41, %35 : vector<8x128xf32>
      %43 = arith.mulf %42, %40 : vector<8x128xf32>
      %44 = arith.mulf %35, %12 : vector<8x128xf32>
      %45 = arith.addf %43, %44 : vector<8x128xf32>
      %c0_22 = arith.constant 0 : index
      %c0_23 = arith.constant 0 : index
      %46 = vector.load %arg15[%c0_22, %c0_23] : memref<8x128xf32, #tpu.memory_space<vmem>>, vector<8x128xf32>
      tpu.vector_store %arg15[%c0_22, %c0_23], %45 {strides = array<i32>} : memref<8x128xf32, #tpu.memory_space<vmem>>, vector<8x128xf32>,
      %47 = arith.truncf %45 : vector<8x128xf32> to vector<8x128xbf16>
      %c0_24 = arith.constant 0 : index
      %c0_25 = arith.constant 0 : index
      %48 = vector.load %arg11[%c0_24, %c0_25] : memref<128x128xbf16, #tpu.memory_space<vmem>>, vector<128x128xbf16>
      %cst_26 = arith.constant dense<0.000000e+00> : vector<8x128xf32>
      %49 = tpu.matmul %47, %48, %cst_26 {dimension_numbers = #tpu.dot_dimension_numbers<[1], [0], [0], [1], [0, 0, 1, 1], [], []>} : vector<8x128xbf16>, vector<128x128xbf16>, vector<8x128xf32> -> vector<8x128xf32>
      %c0_27 = arith.constant 0 : index
      %c0_28 = arith.constant 0 : index
      %50 = vector.load %arg12[%c0_27, %c0_28] : memref<1x128xf32, #tpu.memory_space<vmem>>, vector<1x128xf32>
      %51 = vector.broadcast %50 : vector<1x128xf32> to vector<8x128xf32>
      %52 = arith.addf %49, %51 : vector<8x128xf32>
      %c0_29 = arith.constant 0 : index
      %c0_30 = arith.constant 0 : index
      %53 = vector.load %arg16[%c0_29, %c0_30] : memref<8x128xf32, #tpu.memory_space<vmem>>, vector<8x128xf32>
      tpu.vector_store %arg16[%c0_29, %c0_30], %52 {strides = array<i32>} : memref<8x128xf32, #tpu.memory_space<vmem>>, vector<8x128xf32>,
    } else {
    }
    return
  }
  func.func @transform_0(%arg0: i32) -> (i32, i32, i32) {
    %c0_i32 = arith.constant 0 : i32
    %c0_i32_0 = arith.constant 0 : i32
    %c0_i32_1 = arith.constant 0 : i32
    %c0_i32_2 = arith.constant 0 : i32
    return %c0_i32, %c0_i32_0, %c0_i32_1 : i32, i32, i32
  }
  func.func @transform_1(%arg0: i32) -> (i32, i32) {
    %c0_i32 = arith.constant 0 : i32
    %c0_i32_0 = arith.constant 0 : i32
    %c0_i32_1 = arith.constant 0 : i32
    return %c0_i32, %c0_i32_0 : i32, i32
  }
  func.func @transform_2(%arg0: i32) -> (i32, i32) {
    %c0_i32 = arith.constant 0 : i32
    %c0_i32_0 = arith.constant 0 : i32
    %c0_i32_1 = arith.constant 0 : i32
    return %c0_i32, %c0_i32_0 : i32, i32
  }
  func.func @transform_3(%arg0: i32) -> (i32, i32) {
    %c0_i32 = arith.constant 0 : i32
    %c0_i32_0 = arith.constant 0 : i32
    %c0_i32_1 = arith.constant 0 : i32
    return %c0_i32, %c0_i32_0 : i32, i32
  }
  func.func @transform_4(%arg0: i32) -> (i32, i32) {
    %c0_i32 = arith.constant 0 : i32
    %c0_i32_0 = arith.constant 0 : i32
    %c0_i32_1 = arith.constant 0 : i32
    return %c0_i32, %c0_i32_0 : i32, i32
  }
  func.func @transform_5(%arg0: i32) -> (i32, i32) {
    %c0_i32 = arith.constant 0 : i32
    %c0_i32_0 = arith.constant 0 : i32
    %c0_i32_1 = arith.constant 0 : i32
    return %c0_i32, %c0_i32_0 : i32, i32
  }
  func.func @transform_6(%arg0: i32) -> (i32, i32) {
    %c0_i32 = arith.constant 0 : i32
    %c0_i32_0 = arith.constant 0 : i32
    %c0_i32_1 = arith.constant 0 : i32
    return %c0_i32, %c0_i32_0 : i32, i32
  }
  func.func @transform_7(%arg0: i32) -> (i32, i32) {
    %c0_i32 = arith.constant 0 : i32
    %c0_i32_0 = arith.constant 0 : i32
    %c0_i32_1 = arith.constant 0 : i32
    return %c0_i32, %c0_i32_0 : i32, i32
  }
  func.func @transform_8(%arg0: i32) -> (i32, i32) {
    %c0_i32 = arith.constant 0 : i32
    %c0_i32_0 = arith.constant 0 : i32
    %c0_i32_1 = arith.constant 0 : i32
    return %c0_i32, %c0_i32_0 : i32, i32
  }
  func.func @transform_9(%arg0: i32) -> (i32, i32) {
    %c0_i32 = arith.constant 0 : i32
    %c0_i32_0 = arith.constant 0 : i32
    %c0_i32_1 = arith.constant 0 : i32
    return %c0_i32, %c0_i32_0 : i32, i32
  }
  func.func @transform_10(%arg0: i32) -> (i32, i32) {
    %c0_i32 = arith.constant 0 : i32
    %c0_i32_0 = arith.constant 0 : i32
    %c0_i32_1 = arith.constant 0 : i32
    return %c0_i32, %c0_i32_0 : i32, i32
  }
  func.func @transform_11(%arg0: i32) -> (i32, i32) {
    %c0_i32 = arith.constant 0 : i32
    %c0_i32_0 = arith.constant 0 : i32
    %c0_i32_1 = arith.constant 0 : i32
    return %c0_i32, %c0_i32_0 : i32, i32
  }
  func.func @transform_12(%arg0: i32) -> (i32, i32) {
    %c0_i32 = arith.constant 0 : i32
    %c0_i32_0 = arith.constant 0 : i32
    return %c0_i32, %arg0 : i32, i32
  }
  func.func @transform_13(%arg0: i32) -> (i32, i32) {
    %c0_i32 = arith.constant 0 : i32
    %c0_i32_0 = arith.constant 0 : i32
    return %arg0, %c0_i32 : i32, i32
  }
  func.func @transform_14(%arg0: i32) -> (i32, i32) {
    %c0_i32 = arith.constant 0 : i32
    %c0_i32_0 = arith.constant 0 : i32
    %c0_i32_1 = arith.constant 0 : i32
    return %c0_i32, %c0_i32_0 : i32, i32
  }
  func.func @transform_15(%arg0: i32) -> (i32, i32) {
    %c0_i32 = arith.constant 0 : i32
    %c0_i32_0 = arith.constant 0 : i32
    %c0_i32_1 = arith.constant 0 : i32
    return %c0_i32, %c0_i32_0 : i32, i32
  }
}

</mosaic_0001>

<bundles_post_ra>
// kernel: tpu_custom_call.1
= control target key start
LH: loop header
LB: loop body
LE: loop exit
PB: predicated region body
PF: predicated region fallthrough
CT: control target
= control target key end

     0   :  { %6 = vsyncpa [#allocation3], 0  ;;  %s124_s0 = inlined_call_operand.hbm [shape: f32[8,128], index: 0, kind: input, shape index: {}]   ;;  %s125_s1 = inlined_call_operand.hbm [shape: f32[8,128], index: 1, kind: output, shape index: {}]  }
   0x1   :  { %7 = vsyncpa [#allocation4], 0  ;;  %s88_s6 = smov [#allocation2]   ;;  %s40_s10 = scalar_lea.hbm %s124_s0, 128 }
   0x2   :  { %s14_s7 = sshll.u32 %s88_s6, 4  ;;  %p41_p0 = scmp.ne.s32.totalorder %s124_s0, %s40_s10  ;;  %s15_s7 = int_to_ptr.vmem [resolvable:$true] %s14_s7 }
   0x3   :  { %p44_p1 = scmp.lt.u32.totalorder %s40_s10, %s124_s0 }
   0x5   :  { %p46_p2 = pnand %p44_p1, %p41_p0 }
   0x7   :  { %49 = shalt.err (!%p46_p2)
}
   0x8   :  { %s50_s15 = scalar_lea.vmem %s15_s7, 128  ;;  %p55_p4 = scmp.lt.s32.totalorder %s15_s7, %s15_s7 }
   0x9   :  { %p51_p3 = scmp.ne.s32.totalorder %s15_s7, %s50_s15  ;;  %p56_p5 = scmp.lt.s32.totalorder %s50_s15, %s50_s15 }
   0xb   :  { %p57_p6 = por %p56_p5, %p55_p4 }
   0xd   :  { %p58_p7 = pnand %p57_p6, %p51_p3 }
   0xf   :  { %61 = shalt.err (!%p58_p7)
}
  0x10   :  { %17 = dma.hbm_to_vmem [thread:$0]  %s124_s0, 128, %s15_s7, [#allocation3]  }
  0x11   :  { %84 = dma.done.wait [#allocation3], 128  }
  0x12   :  { %85 = vsyncadd [#allocation3], 4294967168  ;;  %s89_s18 = smov [#allocation5]   ;;  %v21_v0 = vld [vmem:[#allocation2] sm:$0xff] }
  0x13   :  { %s29_s19 = sshll.u32 %s89_s18, 4  ;;  %22 = vst [vmem:[#allocation5] sm:$0xff] %v21_v0  ;;  %s30_s19 = int_to_ptr.vmem [resolvable:$true] %s29_s19 }
  0x14   :  { %s62_s20 = scalar_lea.vmem %s30_s19, 128  ;;  %p67_p9 = scmp.lt.s32.totalorder %s30_s19, %s30_s19 }
  0x15   :  { %p63_p8 = scmp.ne.s32.totalorder %s30_s19, %s62_s20  ;;  %p68_p10 = scmp.lt.s32.totalorder %s62_s20, %s62_s20 }
  0x17   :  { %p69_p11 = por %p68_p10, %p67_p9 }
  0x19   :  { %p70_p12 = pnand %p69_p11, %p63_p8 }
  0x1b   :  { %73 = shalt.err (!%p70_p12)
}
  0x1c   :  { %s74_s23 = scalar_lea.hbm %s125_s1, 128 }
  0x1d   :  { %p75_p13 = scmp.ne.s32.totalorder %s125_s1, %s74_s23  ;;  %p78_p0 = scmp.lt.u32.totalorder %s74_s23, %s125_s1 }
  0x1f   :  { %p80_p1 = pnand %p78_p0, %p75_p13 }
  0x21   :  { %83 = shalt.err (!%p80_p1)
}
  0x22   :  { %32 = dma.vmem_to_hbm [thread:$0]  %s30_s19, 128, %s125_s1, [#allocation4]  }
  0x23   :  { %86 = dma.done.wait [#allocation4], 128  }
  0x24   :  { %87 = vsyncadd [#allocation4], 4294967168 }
  0x25   :  { %36 = vsyncpa [#allocation3], 1 }
  0x26   :  { %37 = vsyncpa [#allocation4], 1 }

// kernel: tpu_custom_call.1
= control target key start
LH: loop header
LB: loop body
LE: loop exit
PB: predicated region body
PF: predicated region fallthrough
CT: control target
= control target key end

     0   :  { %21 = vsyncpa [#allocation4], 0  ;;  %s2910_s0 = inlined_call_operand.hbm [shape: bf16[8,8,128], index: 0, kind: input, shape index: {}]   ;;  %s2911_s1 = inlined_call_operand.hbm [shape: f32[8,128], index: 1, kind: input, shape index: {}]   ;;  %s2912_s2 = inlined_call_operand.hbm [shape: bf16[128,128], index: 2, kind: input, shape index: {}]   ;;  %s2913_s3 = inlined_call_operand.hbm [shape: bf16[128,128], index: 3, kind: input, shape index: {}]   ;;  %s2914_s4 = inlined_call_operand.vmem [shape: f32[1,128], index: 4, kind: input, shape index: {}]   ;;  %s2915_s5 = inlined_call_operand.vmem [shape: f32[1,128], index: 5, kind: input, shape index: {}]   ;;  %s2916_s6 = inlined_call_operand.hbm [shape: bf16[128,384], index: 6, kind: input, shape index: {}]   ;;  %s2917_s7 = inlined_call_operand.hbm [shape: bf16[128,384], index: 7, kind: input, shape index: {}]   ;;  %s2918_s8 = inlined_call_operand.vmem [shape: f32[1,384], index: 8, kind: input, shape index: {}]   ;;  %s2919_s9 = inlined_call_operand.vmem [shape: f32[1,384], index: 9, kind: input, shape index: {}]   ;;  %s2920_s10 = inlined_call_operand.hbm [shape: bf16[128,128], index: 10, kind: input, shape index: {}]   ;;  %s2921_s11 = inlined_call_operand.vmem [shape: f32[1,128], index: 11, kind: input, shape index: {}]   ;;  %s2922_s12 = inlined_call_operand.vmem [shape: bf16[8,128], index: 12, kind: input, shape index: {}]   ;;  %s2923_s13 = inlined_call_operand.hbm [shape: bf16[128,384], index: 13, kind: input, shape index: {}]   ;;  %s2924_s14 = inlined_call_operand.hbm [shape: f32[8,128], index: 14, kind: output, shape index: {0}]   ;;  %s2925_s15 = inlined_call_operand.hbm [shape: f32[8,128], index: 15, kind: output, shape index: {1}]  }
   0x1   :  { %22 = vsyncpa [#allocation7], 0 }
   0x2   :  { %23 = vsyncpa [#allocation10], 0 }
   0x3   :  { %24 = vsyncpa [#allocation13], 0 }
   0x4   :  { %25 = vsyncpa [#allocation16], 0 }
   0x5   :  { %26 = vsyncpa [#allocation5], 0 }
   0x6   :  { %27 = vsyncpa [#allocation19], 0  ;;  %s2496_s18 = smov [#allocation6]   ;;  %s2262_s22 = scalar_lea.hbm %s2911_s1, 128 }
   0x7   :  { %s46_s19 = sshll.u32 %s2496_s18, 4  ;;  %p2263_p0 = scmp.ne.s32.totalorder %s2911_s1, %s2262_s22  ;;  %s47_s19 = int_to_ptr.vmem [resolvable:$true] %s46_s19 }
   0x8   :  { %p2266_p1 = scmp.lt.u32.totalorder %s2262_s22, %s2911_s1 }
   0xa   :  { %p2268_p2 = pnand %p2266_p1, %p2263_p0 }
   0xc   :  { %2271 = shalt.err (!%p2268_p2)
}
   0xd   :  { %s2272_s27 = scalar_lea.vmem %s47_s19, 128  ;;  %p2277_p4 = scmp.lt.s32.totalorder %s47_s19, %s47_s19 }
   0xe   :  { %p2273_p3 = scmp.ne.s32.totalorder %s47_s19, %s2272_s27  ;;  %p2278_p5 = scmp.lt.s32.totalorder %s2272_s27, %s2272_s27 }
  0x10   :  { %p2279_p6 = por %p2278_p5, %p2277_p4 }
  0x12   :  { %p2280_p7 = pnand %p2279_p6, %p2273_p3 }
  0x14   :  { %2283 = shalt.err (!%p2280_p7)
}
  0x15   :  { %49 = dma.hbm_to_vmem [thread:$0]  %s2911_s1, 128, %s47_s19, [#allocation7]  }
  0x16   :  { %s2497_s30 = smov [#allocation9]   ;;  %s2284_s20 = scalar_lea.hbm %s2913_s3, 1024 }
  0x17   :  { %s67_s16 = sshll.u32 %s2497_s30, 4  ;;  %p2285_p8 = scmp.ne.s32.totalorder %s2913_s3, %s2284_s20  ;;  %s68_s16 = int_to_ptr.vmem [resolvable:$true] %s67_s16 }
  0x18   :  { %p2288_p9 = scmp.lt.u32.totalorder %s2284_s20, %s2913_s3 }
  0x1a   :  { %p2290_p10 = pnand %p2288_p9, %p2285_p8 }
  0x1c   :  { %2293 = shalt.err (!%p2290_p10)
}
  0x1d   :  { %s2294_s25 = scalar_lea.vmem %s68_s16, 1024  ;;  %p2299_p12 = scmp.lt.s32.totalorder %s68_s16, %s68_s16 }
  0x1e   :  { %p2295_p11 = scmp.ne.s32.totalorder %s68_s16, %s2294_s25  ;;  %p2300_p13 = scmp.lt.s32.totalorder %s2294_s25, %s2294_s25 }
  0x20   :  { %p2301_p0 = por %p2300_p13, %p2299_p12 }
  0x22   :  { %p2302_p1 = pnand %p2301_p0, %p2295_p11 }
  0x24   :  { %2305 = shalt.err (!%p2302_p1)
}
  0x25   :  { %s2498_s1 = smov 64   ;;  %s2499_s19 = smov 4  }
  0x26   :  { %73 = dma.hbm_to_vmem [thread:$0]  %s2913_s3, 1024, %s68_s16, [#allocation10], %s2498_s1, %s2498_s1, %s2499_s19  }
  0x27   :  { %s2500_s28 = smov [#allocation12]   ;;  %s2501_s30 = smov [#allocation3]  }
  0x28   :  { %s95_s29 = sshll.u32 %s2500_s28, 4  ;;  %s33_s17 = sshll.u32 %s2501_s30, 4  ;;  %s96_s29 = int_to_ptr.vmem [resolvable:$true] %s95_s29  ;;  %s2621_s17 = int_to_ptr.vmem [resolvable:$true] %s33_s17 }
  0x29   :  { %s2306_s21 = scalar_lea.hbm %s2917_s7, 3072 }
  0x2a   :  { %p2307_p2 = scmp.ne.s32.totalorder %s2917_s7, %s2306_s21  ;;  %p2310_p3 = scmp.lt.u32.totalorder %s2306_s21, %s2917_s7 }
  0x2c   :  { %p2312_p4 = pnand %p2310_p3, %p2307_p2 }
  0x2e   :  { %2315 = shalt.err (!%p2312_p4)
}
  0x2f   :  { %s2316_s3 = scalar_lea.vmem %s96_s29, 3072  ;;  %p2321_p6 = scmp.lt.s32.totalorder %s96_s29, %s96_s29 }
  0x30   :  { %p2317_p5 = scmp.ne.s32.totalorder %s96_s29, %s2316_s3  ;;  %p2322_p7 = scmp.lt.s32.totalorder %s2316_s3, %s2316_s3 }
  0x32   :  { %p2323_p8 = por %p2322_p7, %p2321_p6 }
  0x34   :  { %p2324_p9 = pnand %p2323_p8, %p2317_p5 }
  0x36   :  { %2327 = shalt.err (!%p2324_p9)
}
  0x37   :  { %s2502_s16 = smov 192   ;;  %s2503_s26 = smov 12  }
  0x38   :  { %101 = dma.hbm_to_vmem [thread:$0]  %s2917_s7, 3072, %s96_s29, [#allocation13], %s2502_s16, %s2502_s16, %s2503_s26  }
  0x39   :  { %s2328_s20 = scalar_lea.hbm %s2910_s0, 512 }
  0x3a   :  { %p2329_p10 = scmp.ne.s32.totalorder %s2910_s0, %s2328_s20  ;;  %p2332_p11 = scmp.lt.u32.totalorder %s2328_s20, %s2910_s0 }
  0x3c   :  { %p2334_p12 = pnand %p2332_p11, %p2329_p10 }
  0x3e   :  { %2337 = shalt.err (!%p2334_p12)
}
  0x3f   :  { %s2338_s25 = scalar_lea.vmem %s2621_s17, 512  ;;  %p2343_p0 = scmp.lt.s32.totalorder %s2621_s17, %s2621_s17 }
  0x40   :  { %p2339_p13 = scmp.ne.s32.totalorder %s2621_s17, %s2338_s25  ;;  %p2344_p1 = scmp.lt.s32.totalorder %s2338_s25, %s2338_s25 }
  0x42   :  { %p2345_p2 = por %p2344_p1, %p2343_p0 }
  0x44   :  { %p2346_p3 = pnand %p2345_p2, %p2339_p13 }
  0x46   :  { %2349 = shalt.err (!%p2346_p3)
}
  0x47   :  { %39 = dma.hbm_to_vmem [thread:$0]  %s2910_s0, 512, %s2621_s17, [#allocation4], %s2498_s1, %s2498_s1, %s2499_s19  }
  0x48   :  { %s2504_s3 = smov [#allocation8]   ;;  %s2505_s28 = smov [#allocation11]  }
  0x49   :  { %s55_s27 = sshll.u32 %s2504_s3, 4  ;;  %s83_s30 = sshll.u32 %s2505_s28, 4  ;;  %s56_s27 = int_to_ptr.vmem [resolvable:$true] %s55_s27  ;;  %s2658_s30 = int_to_ptr.vmem [resolvable:$true] %s83_s30 }
  0x4a   :  { %s2350_s21 = scalar_lea.hbm %s2912_s2, 1024 }
  0x4b   :  { %p2351_p4 = scmp.ne.s32.totalorder %s2912_s2, %s2350_s21  ;;  %p2354_p5 = scmp.lt.u32.totalorder %s2350_s21, %s2912_s2 }
  0x4d   :  { %p2356_p6 = pnand %p2354_p5, %p2351_p4 }
  0x4f   :  { %2359 = shalt.err (!%p2356_p6)
}
  0x50   :  { %s2360_s0 = scalar_lea.vmem %s56_s27, 1024  ;;  %p2365_p8 = scmp.lt.s32.totalorder %s56_s27, %s56_s27 }
  0x51   :  { %p2361_p7 = scmp.ne.s32.totalorder %s56_s27, %s2360_s0  ;;  %p2366_p9 = scmp.lt.s32.totalorder %s2360_s0, %s2360_s0 }
  0x53   :  { %p2367_p10 = por %p2366_p9, %p2365_p8 }
  0x55   :  { %p2368_p11 = pnand %p2367_p10, %p2361_p7 }
  0x57   :  { %2371 = shalt.err (!%p2368_p11)
}
  0x58   :  { %61 = dma.hbm_to_vmem [thread:$0]  %s2912_s2, 1024, %s56_s27, [#allocation7], %s2498_s1, %s2498_s1, %s2499_s19  }
  0x59   :  { %s2372_s28 = scalar_lea.hbm %s2916_s6, 3072 }
  0x5a   :  { %p2373_p12 = scmp.ne.s32.totalorder %s2916_s6, %s2372_s28  ;;  %p2376_p13 = scmp.lt.u32.totalorder %s2372_s28, %s2916_s6 }
  0x5c   :  { %p2378_p0 = pnand %p2376_p13, %p2373_p12 }
  0x5e   :  { %2381 = shalt.err (!%p2378_p0)
}
  0x5f   :  { %s2382_s23 = scalar_lea.vmem %s2658_s30, 3072  ;;  %p2387_p2 = scmp.lt.s32.totalorder %s2658_s30, %s2658_s30 }
  0x60   :  { %p2383_p1 = scmp.ne.s32.totalorder %s2658_s30, %s2382_s23  ;;  %p2388_p3 = scmp.lt.s32.totalorder %s2382_s23, %s2382_s23 }
  0x62   :  { %p2389_p4 = por %p2388_p3, %p2387_p2 }
  0x64   :  { %p2390_p5 = pnand %p2389_p4, %p2383_p1 }
  0x66   :  { %2393 = shalt.err (!%p2390_p5)
}
  0x67   :  { %89 = dma.hbm_to_vmem [thread:$0]  %s2916_s6, 3072, %s2658_s30, [#allocation10], %s2502_s16, %s2502_s16, %s2503_s26  }
  0x68   :  { %s2506_s24 = smov [#allocation14]   ;;  %s2507_s0 = smov [#allocation15]  }
  0x69   :  { %s111_s25 = sshll.u32 %s2506_s24, 4  ;;  %s127_s17 = sshll.u32 %s2507_s0, 4  ;;  %s112_s25 = int_to_ptr.vmem [resolvable:$true] %s111_s25  ;;  %s2695_s17 = int_to_ptr.vmem [resolvable:$true] %s127_s17 }
  0x6a   :  { %s2394_s3 = scalar_lea.hbm %s2920_s10, 1024 }
  0x6b   :  { %p2395_p6 = scmp.ne.s32.totalorder %s2920_s10, %s2394_s3  ;;  %p2398_p7 = scmp.lt.u32.totalorder %s2394_s3, %s2920_s10 }
  0x6d   :  { %p2400_p8 = pnand %p2398_p7, %p2395_p6 }
  0x6f   :  { %2403 = shalt.err (!%p2400_p8)
}
  0x70   :  { %s2404_s6 = scalar_lea.vmem %s112_s25, 1024  ;;  %p2409_p10 = scmp.lt.s32.totalorder %s112_s25, %s112_s25 }
  0x71   :  { %p2405_p9 = scmp.ne.s32.totalorder %s112_s25, %s2404_s6  ;;  %p2410_p11 = scmp.lt.s32.totalorder %s2404_s6, %s2404_s6 }
  0x73   :  { %p2411_p12 = por %p2410_p11, %p2409_p10 }
  0x75   :  { %p2412_p13 = pnand %p2411_p12, %p2405_p9 }
  0x77   :  { %2415 = shalt.err (!%p2412_p13)
}
  0x78   :  { %117 = dma.hbm_to_vmem [thread:$0]  %s2920_s10, 1024, %s112_s25, [#allocation13], %s2498_s1, %s2498_s1, %s2499_s19  }
  0x79   :  { %s2416_s27 = scalar_lea.hbm %s2923_s13, 3072 }
  0x7a   :  { %p2417_p0 = scmp.ne.s32.totalorder %s2923_s13, %s2416_s27  ;;  %p2420_p1 = scmp.lt.u32.totalorder %s2416_s27, %s2923_s13 }
  0x7c   :  { %p2422_p2 = pnand %p2420_p1, %p2417_p0 }
  0x7e   :  { %2425 = shalt.err (!%p2422_p2)
}
  0x7f   :  { %s2426_s3 = scalar_lea.vmem %s2695_s17, 3072  ;;  %p2431_p4 = scmp.lt.s32.totalorder %s2695_s17, %s2695_s17 }
  0x80   :  { %p2427_p3 = scmp.ne.s32.totalorder %s2695_s17, %s2426_s3  ;;  %p2432_p5 = scmp.lt.s32.totalorder %s2426_s3, %s2426_s3 }
  0x82   :  { %p2433_p6 = por %p2432_p5, %p2431_p4 }
  0x84   :  { %p2434_p7 = pnand %p2433_p6, %p2427_p3 }
  0x86   :  { %2437 = shalt.err (!%p2434_p7)
}
  0x87   :  { %133 = dma.hbm_to_vmem [thread:$0]  %s2923_s13, 3072, %s2695_s17, [#allocation16], %s2502_s16, %s2502_s16, %s2503_s26  }
  0x88   :  { %2482 = dma.done.wait [#allocation4], 512  }
  0x89   :  { %2483 = vsyncadd [#allocation4], 4294966784 }
  0x8a   :  { %2484 = dma.done.wait [#allocation7], 1152  }
  0x8b   :  { %2485 = vsyncadd [#allocation7], 4294966144 }
  0x8c   :  { %2486 = dma.done.wait [#allocation10], 4096  }
  0x8d   :  { %2487 = vsyncadd [#allocation10], 4294963200 }
  0x8e   :  { %2488 = dma.done.wait [#allocation13], 4096  }
  0x8f   :  { %2489 = vsyncadd [#allocation13], 4294963200 }
  0x90   :  { %2490 = dma.done.wait [#allocation16], 3072  }
  0x91   :  { %2491 = vsyncadd [#allocation16], 4294964224  ;;  %v2508_v0 = vmov 0.0   ;;  %vm2509_vm0 = vmmov 0   ;;  %v2076_v1 = vld [vmem:[#allocation8] sm:$0xff]   ;;  %v2078_v3 = vld [vmem:[#allocation8 + $0x8] sm:$0xff]   ;;  %v442_v25 = vlaneseq }
  0x92   :  { %1922 = vmatprep.subr.bf16.mxu0 %v2508_v0  ;;  %1938 = vmatprep.mubr.msk.bf16.mxu0 %vm2509_vm0, %v2508_v0  ;;  %v2077_v2 = vld [vmem:[#allocation9] sm:$0xff]   ;;  %v2079_v4 = vld [vmem:[#allocation9 + $0x8] sm:$0xff]   ;;  %v2081_v5 = vld [vmem:[#allocation9 + $0x10] sm:$0xff]   ;;  %v2510_v23 = vmov 1966171168   ;;  %vm847_vm1 = vcmask 1041409  }
  0x93   :  { %1923 = vmatpush3.bf16.msra.mxu0 %v2076_v1  ;;  %1942 = vmatprep.subr.bf16.mxu1 %v2077_v2  ;;  %v2080_v6 = vld [vmem:[#allocation8 + $0x10] sm:$0xff]   ;;  %v2083_v7 = vld [vmem:[#allocation9 + $0x18] sm:$0xff]   ;;  %v2085_v9 = vld [vmem:[#allocation9 + $0x20] sm:$0xff]   ;;  %v440_v24 = vunpack.c.l.s4 %v2510_v23  ;;  %v2757_v27 = vshrl.u32 %v442_v25, 7  ;;  %vm849_vm2 = vcmask 1042434   ;;  %vm851_vm3 = vcmask 1043459  }
  0x94   :  { %1924 = vmatprep.subr.bf16.mxu0 %v2508_v0  ;;  %1943 = vmatpush3.bf16.msra.mxu1 %v2077_v2  ;;  %v2082_v8 = vld [vmem:[#allocation8 + $0x18] sm:$0xff]   ;;  %v2084_v10 = vld [vmem:[#allocation8 + $0x20] sm:$0xff]   ;;  %v2086_v12 = vld [vmem:[#allocation8 + $0x28] sm:$0xff]   ;;  %vm853_vm4 = vcmask 1044484   ;;  %vm855_vm5 = vcmask 1045509   ;;  %vm857_vm6 = vcmask 1046534  }
  0x95   :  { %1944 = vmatprep.subr.bf16.mxu1 %v2079_v4  ;;  %v2739_v11 = vld [vmem:[#allocation3] sm:$0xff]   ;;  %v2087_v13 = vld [vmem:[#allocation9 + $0x28] sm:$0xff]   ;;  %v2089_v14 = vld [vmem:[#allocation9 + $0x30] sm:$0xff]   ;;  %v441_v26 = vunpack.c.0.s8 %v440_v24  ;;  %v2764_v37 = vsub.s32 0, %v2757_v27  ;;  %vm859_vm7 = vcmask 1047559  }
  0x96   :  { %1958 = vmatprep.mubr.bf16.mxu1 %v2739_v11  ;;  %v2088_v15 = vld [vmem:[#allocation8 + $0x30] sm:$0xff]   ;;  %v2091_v16 = vld [vmem:[#allocation9 + $0x38] sm:$0xff]   ;;  %v2744_v19 = vld [vmem:[#allocation3 + $0x8] sm:$0xff]  }
  0x97   :  { %1925 = vmatpush3.bf16.msra.mxu0 %v2078_v3  ;;  %v2090_v17 = vld [vmem:[#allocation8 + $0x38] sm:$0xff]   ;;  %v2747_v20 = vld [vmem:[#allocation3 + $0x10] sm:$0xff]   ;;  %v2750_v22 = vld [vmem:[#allocation3 + $0x18] sm:$0xff]   ;;  %v444_v29 = vsub.s32 %v441_v26, %v2757_v27 }
  0x98   :  { %1926 = vmatprep.subr.bf16.mxu0 %v2508_v0  ;;  %1945 = vmatpush3.bf16.msra.mxu1 %v2079_v4  ;;  %v171_v18 = vld [vmem:[#allocation6] sm:$0xff] }
  0x99   :  { %1946 = vmatprep.subr.bf16.mxu1 %v2081_v5  ;;  %v172_v21 = vpack.c.bf16 %v171_v18, %v171_v18  ;;  %v1760_v28 = vld [vmem:[%s2914_s4] ss:$0 sm:$0xff] }
  0x9b   :  { %1927 = vmatpush3.bf16.msra.mxu0 %v2080_v6 }
  0x9c   :  { %1928 = vmatprep.subr.bf16.mxu0 %v2508_v0  ;;  %1947 = vmatpush3.bf16.msra.mxu1 %v2081_v5 }
  0x9d   :  { %1948 = vmatprep.subr.bf16.mxu1 %v2083_v7 }
  0x9f   :  { %1929 = vmatpush3.bf16.msra.mxu0 %v2082_v8 }
  0xa0   :  { %1930 = vmatprep.subr.bf16.mxu0 %v2508_v0  ;;  %1949 = vmatpush3.bf16.msra.mxu1 %v2083_v7 }
  0xa1   :  { %1950 = vmatprep.subr.bf16.mxu1 %v2085_v9 }
  0xa3   :  { %1931 = vmatpush3.bf16.msra.mxu0 %v2084_v10  ;;  %v1781_v10 = vld [vmem:[%s2915_s5] ss:$0 sm:$0xff] }
  0xa4   :  { %1932 = vmatprep.subr.bf16.mxu0 %v2508_v0  ;;  %1951 = vmatpush3.bf16.msra.mxu1 %v2085_v9 }
  0xa5   :  { %1952 = vmatprep.subr.bf16.mxu1 %v2087_v13 }
  0xa7   :  { %1933 = vmatpush3.bf16.msra.mxu0 %v2086_v12 }
  0xa8   :  { %1934 = vmatprep.subr.bf16.mxu0 %v2508_v0  ;;  %1953 = vmatpush3.bf16.msra.mxu1 %v2087_v13 }
  0xa9   :  { %1954 = vmatprep.subr.bf16.mxu1 %v2089_v14 }
  0xab   :  { %1935 = vmatpush3.bf16.msra.mxu0 %v2088_v15 }
  0xac   :  { %1936 = vmatprep.subr.bf16.mxu0 %v2508_v0  ;;  %1955 = vmatpush3.bf16.msra.mxu1 %v2089_v14 }
  0xad   :  { %1956 = vmatprep.subr.bf16.mxu1 %v2091_v16 }
  0xaf   :  { %1937 = vmatpush3.bf16.msra.mxu0 %v2090_v17 }
  0xb0   :  { %1957 = vmatpush3.bf16.msra.mxu1 %v2091_v16 }
  0xb1   :  { %1966 = vmatprep.subr.bf16.mxu1 %v2508_v0 }
  0xb2   :  { %1939 = vmatmul.mubr.bf16.vlgmr.msra.gmra.mrb[0].mxu0 %v172_v21 }
  0xb3   :  { %1959 = vmatmul.mubr.bf16.vlgmr.msra.gmra.mrb[0].mxu1 %v2744_v19 }
  0xb4   :  { %1962 = vmatprep.mubr.bf16.mxu1 %v2747_v20 }
  0xbb   :  { %1963 = vmatmul.mubr.bf16.gmra.mrb[4].mxu1 %v2750_v22 }
  0xbc   :  { %1982 = vmatprep.mubr.msk.bf16.mxu1 %vm2509_vm0, %v2508_v0 }
 0x185   :  { %v278_v30 = vpop.f32.mrb[0].mxu0 }
 0x186   :  { %v279_v31 = vadd.f32 %v1760_v28, %v278_v30  ;;  %v1940_v32 = vpop.f32.mrb[1].mxu0  ;;  %v1960_v34 = vpop.f32.mrb[0].mxu1 }
 0x187   :  { %v281_v33 = vpop.f32.mrb[2].mxu0  ;;  %v406_v39 = vpop.f32.mrb[1].mxu1  ;;  %v2096_v32 = vld [vmem:[#allocation11] ss:$12 sps:$4 sm:$0xff]  }
 0x188   :  { %v438_v35 = vcombine.high %v279_v31, %v279_v31  ;;  %v445_v36 = vrot.slane %v279_v31, %v444_v29  ;;  %v1941_v38 = vpop.f32.mrb[3].mxu0  ;;  %v1961_v40 = vpop.f32.mrb[2].mxu1  ;;  %v2098_v33 = vld [vmem:[#allocation11 + $0x4] ss:$12 sps:$4 sm:$0xff]  }
 0x189   :  { %v409_v44 = vpop.f32.mrb[3].mxu1  ;;  %991 = vmatprep.subr.bf16.mxu0 %v2098_v33  ;;  %v2100_v38 = vld [vmem:[#allocation11 + $0x18] ss:$12 sps:$4 sm:$0xff]  }
 0x18a   :  { %v452_v41 = vrot.slane %v438_v35, %v444_v29  ;;  %v453_v42 = vcombine.high %v445_v36, %v445_v36  ;;  %v461_v43 = vrot.slane %v445_v36, %v444_v29  ;;  %v2102_v35 = vld [vmem:[#allocation11 + $0x1c] ss:$12 sps:$4 sm:$0xff]   ;;  %v2103_v36 = vld [vmem:[#allocation11 + $0x20] ss:$12 sps:$4 sm:$0xff]   ;;  %992 = vmatpush1.bf16.msra.mxu0 %v2096_v32 }
 0x18b   :  { %993 = vmatprep.subr.bf16.mxu0 %v2102_v35 }
 0x18c   :  { %v454_v45 = vcombine.high %v452_v41, %v452_v41  ;;  %v483_v46 = vcombine.high %v461_v43, %v461_v43  ;;  %v490_v47 = vrot.slane %v461_v43, %v2764_v37  ;;  %v475_v48 = vrot.slane %v453_v42, %v444_v29  ;;  %v2110_v42 = vld [vmem:[#allocation11 + $0x4c] ss:$12 sps:$4 sm:$0xff]  }
 0x18d   :  { %v468_v49 = vrot.slane %v452_v41, %v444_v29  ;;  %v2104_v41 = vld [vmem:[#allocation11 + $0x30] ss:$12 sps:$4 sm:$0xff]   ;;  %v2511_v43 = vmov 0  }
 0x18e   :  { %v498_v50 = vrot.slane %v483_v46, %v2764_v37  ;;  %v527_v51 = vadd.f32 %v490_v47, %v406_v39  ;;  %v485_v52 = vcombine.high %v475_v48, %v475_v48  ;;  %v494_v53 = vrot.slane %v475_v48, %v2764_v37  ;;  %v1964_v54 = vpop.f32.mrb[4].mxu1  ;;  %v2106_v39 = vld [vmem:[#allocation11 + $0x34] ss:$12 sps:$4 sm:$0xff]   ;;  %994 = vmatpush1.bf16.msra.mxu0 %v2100_v38  ;;  %v2114_v46 = vld [vmem:[#allocation11 + $0x64] ss:$12 sps:$4 sm:$0xff]  }
 0x18f   :  { %v484_v55 = vcombine.high %v468_v49, %v468_v49  ;;  %v506_v56 = vrot.slane %v468_v49, %v2764_v37  ;;  %v482_v57 = vrot.slane %v454_v45, %v444_v29  ;;  %v422_v61 = vpop.f32.mrb[5].mxu1  ;;  %995 = vmatprep.subr.bf16.mxu0 %v2106_v39  ;;  %1023 = vmatprep.mubr.bf16.mxu0 %v2511_v43  ;;  %v2108_v45 = vld [vmem:[#allocation11 + $0x48] ss:$12 sps:$4 sm:$0xff]   ;;  %v2112_v48 = vld [vmem:[#allocation11 + $0x60] ss:$12 sps:$4 sm:$0xff]  }
 0x190   :  { %v529_v58 = vadd.f32 %v1960_v34, %v498_v50  ;;  %2204 = vtanh.f32 %v527_v51  ;;  %v502_v59 = vrot.slane %v485_v52, %v2764_v37  ;;  %v528_v60 = vadd.f32 %v494_v53, %v409_v44  ;;  %v1965_v1 = vpop.f32.mrb[6].mxu1  ;;  %v2099_v34 = vld [vmem:[#allocation11 + $0x8] ss:$12 sps:$4 sm:$0xff]   ;;  %v2111_v44 = vld [vmem:[#allocation11 + $0x50] ss:$12 sps:$4 sm:$0xff]  }
 0x191   :  { %v514_v62 = vrot.slane %v484_v55, %v2764_v37  ;;  %v531_v63 = vadd.f32 %v506_v56, %v422_v61  ;;  %v486_v2 = vcombine.high %v482_v57, %v482_v57  ;;  %v510_v3 = vrot.slane %v482_v57, %v2764_v37  ;;  %v425_v5 = vpop.f32.mrb[7].mxu1  ;;  %1967 = vmatpush3.bf16.msra.mxu1 %v2099_v34  ;;  %v2115_v47 = vld [vmem:[#allocation11 + $0x68] ss:$12 sps:$4 sm:$0xff]   ;;  %v2119_v50 = vld [vmem:[#allocation11 + $0x80] ss:$12 sps:$4 sm:$0xff]  }
 0x192   :  { %2206 = vtanh.f32 %v529_v58  ;;  %v530_v4 = vadd.f32 %v1961_v40, %v502_v59  ;;  %1968 = vmatprep.subr.bf16.mxu1 %v2508_v0  ;;  %v2107_v40 = vld [vmem:[#allocation11 + $0x38] ss:$12 sps:$4 sm:$0xff]   ;;  %996 = vmatpush1.bf16.msra.mxu0 %v2104_v41  ;;  %v2118_v49 = vld [vmem:[#allocation11 + $0x7c] ss:$12 sps:$4 sm:$0xff]   ;;  %v2122_v52 = vld [vmem:[#allocation11 + $0x94] ss:$12 sps:$4 sm:$0xff]  }
 0x193   :  { %2208 = vtanh.f32 %v528_v60  ;;  %v533_v6 = vadd.f32 %v1964_v54, %v514_v62  ;;  %v518_v7 = vrot.slane %v486_v2, %v2764_v37  ;;  %v532_v8 = vadd.f32 %v510_v3, %v425_v5  ;;  %997 = vmatprep.subr.bf16.mxu0 %v2110_v42  ;;  %v2116_v51 = vld [vmem:[#allocation11 + $0x78] ss:$12 sps:$4 sm:$0xff]   ;;  %v2120_v54 = vld [vmem:[#allocation11 + $0x90] ss:$12 sps:$4 sm:$0xff]   ;;  %v2124_v57 = vld [vmem:[#allocation11 + $0xa8] ss:$12 sps:$4 sm:$0xff]  }
 0x194   :  { %2210 = vtanh.f32 %v530_v4  ;;  %v2123_v53 = vld [vmem:[#allocation11 + $0x98] ss:$12 sps:$4 sm:$0xff]   ;;  %v2127_v56 = vld [vmem:[#allocation11 + $0xb0] ss:$12 sps:$4 sm:$0xff]  }
 0x195   :  { %v534_v9 = vadd.f32 %v1965_v1, %v518_v7  ;;  %2212 = vtanh.f32 %v531_v63  ;;  %1969 = vmatpush3.bf16.msra.mxu1 %v2103_v36  ;;  %v2126_v55 = vld [vmem:[#allocation11 + $0xac] ss:$12 sps:$4 sm:$0xff]   ;;  %v2130_v58 = vld [vmem:[#allocation15 + $0x4] ss:$12 sps:$4 sm:$0xff]  }
 0x196   :  { %2214 = vtanh.f32 %v532_v8  ;;  %1970 = vmatprep.subr.bf16.mxu1 %v2508_v0  ;;  %998 = vmatpush1.bf16.msra.mxu0 %v2108_v45 }
 0x197   :  { %2216 = vtanh.f32 %v533_v6  ;;  %999 = vmatprep.subr.bf16.mxu0 %v2114_v46 }
 0x198   :  { %2218 = vtanh.f32 %v534_v9 }
 0x199   :  { %1971 = vmatpush3.bf16.msra.mxu1 %v2107_v40 }
 0x19a   :  { %v2205_v12 = vpop.eup %2204  ;;  %1972 = vmatprep.subr.bf16.mxu1 %v2508_v0  ;;  %1000 = vmatpush1.bf16.msra.mxu0 %v2112_v48 }
 0x19b   :  { %v550_v13 = vmul.f32 %v2205_v12, %v1781_v10  ;;  %1001 = vmatprep.subr.bf16.mxu0 %v2118_v49 }
 0x19c   :  { %v2207_v14 = vpop.eup %2206 }
 0x19d   :  { %v2209_v15 = vpop.eup %2208  ;;  %558 = vadd.xlane.f32.xlu0 %v550_v13  ;;  %v552_v16 = vmul.f32 %v2207_v14, %v1781_v10  ;;  %1973 = vmatpush3.bf16.msra.mxu1 %v2111_v44 }
 0x19e   :  { %v2211_v17 = vpop.eup %2210  ;;  %v551_v18 = vmul.f32 %v2209_v15, %v1781_v10  ;;  %1974 = vmatprep.subr.bf16.mxu1 %v2508_v0  ;;  %1002 = vmatpush1.bf16.msra.mxu0 %v2116_v51 }
 0x19f   :  { %562 = vadd.xlane.f32.xlu1 %v552_v16  ;;  %v2213_v21 = vpop.eup %2212  ;;  %v553_v23 = vmul.f32 %v2211_v17, %v1781_v10  ;;  %1003 = vmatprep.subr.bf16.mxu0 %v2122_v52 }
 0x1a0   :  { %v2215_v24 = vpop.eup %2214  ;;  %v554_v25 = vmul.f32 %v2213_v21, %v1781_v10 }
 0x1a1   :  { %560 = vadd.xlane.f32.xlu0 %v551_v18  ;;  %v2217_v26 = vpop.eup %2216  ;;  %v555_v28 = vmul.f32 %v2215_v24, %v1781_v10  ;;  %1975 = vmatpush3.bf16.msra.mxu1 %v2115_v47 }
 0x1a2   :  { %v2219_v29 = vpop.eup %2218  ;;  %v556_v30 = vmul.f32 %v2217_v26, %v1781_v10  ;;  %1976 = vmatprep.subr.bf16.mxu1 %v2508_v0  ;;  %1004 = vmatpush1.bf16.msra.mxu0 %v2120_v54 }
 0x1a3   :  { %564 = vadd.xlane.f32.xlu1 %v553_v23  ;;  %v557_v31 = vmul.f32 %v2219_v29, %v1781_v10  ;;  %1005 = vmatprep.subr.bf16.mxu0 %v2126_v55 }
 0x1a5   :  { %566 = vadd.xlane.f32.xlu0 %v554_v25  ;;  %1977 = vmatpush3.bf16.msra.mxu1 %v2119_v50 }
 0x1a6   :  { %1978 = vmatprep.subr.bf16.mxu1 %v2508_v0  ;;  %1006 = vmatpush1.bf16.msra.mxu0 %v2124_v57 }
 0x1a7   :  { %568 = vadd.xlane.f32.xlu1 %v555_v28  ;;  %1239 = vmatprep.subr.bf16.mxu0 %v2130_v58 }
 0x1a9   :  { %570 = vadd.xlane.f32.xlu0 %v556_v30  ;;  %1979 = vmatpush3.bf16.msra.mxu1 %v2123_v53 }
 0x1aa   :  { %1980 = vmatprep.subr.bf16.mxu1 %v2508_v0 }
 0x1ab   :  { %572 = vadd.xlane.f32.xlu1 %v557_v31 }
 0x1ad   :  { %1981 = vmatpush3.bf16.msra.mxu1 %v2127_v56 }
 0x1ae   :  { %1986 = vmatprep.subr.bf16.mxu1 %v2508_v0 }
 0x22a   :  { %v559_v59 = vpop.xlane.xlu0 %558 }
 0x22b   :  { %v574_v60 = vrot.slane %v559_v59, 4 }
 0x22c   :  { %v563_v61 = vpop.xlane.xlu1 %562 }
 0x22d   :  { %v575_v62 = vmax.f32 %v559_v59, %v574_v60  ;;  %v586_v63 = vrot.slane %v563_v61, 4 }
 0x22e   :  { %v561_v1 = vpop.xlane.xlu0 %560 }
 0x22f   :  { %v576_v2 = vrot.slane %v575_v62, 2  ;;  %v587_v3 = vmax.f32 %v563_v61, %v586_v63  ;;  %v580_v4 = vrot.slane %v561_v1, 4 }
 0x230   :  { %v565_v5 = vpop.xlane.xlu1 %564 }
 0x231   :  { %v577_v6 = vmax.f32 %v575_v62, %v576_v2  ;;  %v588_v7 = vrot.slane %v587_v3, 2  ;;  %v581_v8 = vmax.f32 %v561_v1, %v580_v4  ;;  %v592_v9 = vrot.slane %v565_v5, 4 }
 0x232   :  { %v567_v10 = vpop.xlane.xlu0 %566 }
 0x233   :  { %v578_v12 = vrot.slane %v577_v6, 1  ;;  %v589_v13 = vmax.f32 %v587_v3, %v588_v7  ;;  %v582_v14 = vrot.slane %v581_v8, 2  ;;  %v593_v15 = vmax.f32 %v565_v5, %v592_v9 }
 0x234   :  { %v598_v16 = vrot.slane %v567_v10, 4  ;;  %v569_v17 = vpop.xlane.xlu1 %568 }
 0x235   :  { %v579_v18 = vmax.f32 %v577_v6, %v578_v12  ;;  %v590_v21 = vrot.slane %v589_v13, 1  ;;  %v583_v23 = vmax.f32 %v581_v8, %v582_v14  ;;  %v594_v24 = vrot.slane %v593_v15, 2 }
 0x236   :  { %v599_v25 = vmax.f32 %v567_v10, %v598_v16  ;;  %v604_v26 = vrot.slane %v569_v17, 4  ;;  %v571_v28 = vpop.xlane.xlu0 %570 }
 0x237   :  { %v622_v29 = vsub.f32 %v559_v59, %v579_v18  ;;  %v591_v30 = vmax.f32 %v589_v13, %v590_v21  ;;  %v584_v31 = vrot.slane %v583_v23, 1  ;;  %v595_v32 = vmax.f32 %v593_v15, %v594_v24 }
 0x238   :  { %v600_v33 = vrot.slane %v599_v25, 2  ;;  %v605_v34 = vmax.f32 %v569_v17, %v604_v26  ;;  %v610_v35 = vrot.slane %v571_v28, 4  ;;  %v573_v36 = vpop.xlane.xlu1 %572 }
 0x239   :  { %v630_v38 = vmul.f32 1.442695, %v622_v29  ;;  %v624_v39 = vsub.f32 %v563_v61, %v591_v30  ;;  %v585_v40 = vmax.f32 %v583_v23, %v584_v31  ;;  %v596_v41 = vrot.slane %v595_v32, 1 }
 0x23a   :  { %v601_v42 = vmax.f32 %v599_v25, %v600_v33  ;;  %v606_v44 = vrot.slane %v605_v34, 2  ;;  %v611_v45 = vmax.f32 %v571_v28, %v610_v35  ;;  %v616_v46 = vrot.slane %v573_v36, 4 }
 0x23b   :  { %2220 = vpow2.f32 %v630_v38  ;;  %v634_v47 = vmul.f32 1.442695, %v624_v39  ;;  %v623_v48 = vsub.f32 %v561_v1, %v585_v40  ;;  %v597_v49 = vmax.f32 %v595_v32, %v596_v41 }
 0x23c   :  { %v602_v50 = vrot.slane %v601_v42, 1  ;;  %v607_v51 = vmax.f32 %v605_v34, %v606_v44  ;;  %v612_v52 = vrot.slane %v611_v45, 2  ;;  %v617_v53 = vmax.f32 %v573_v36, %v616_v46 }
 0x23d   :  { %2222 = vpow2.f32 %v634_v47  ;;  %v632_v54 = vmul.f32 1.442695, %v623_v48  ;;  %v625_v55 = vsub.f32 %v565_v5, %v597_v49 }
 0x23e   :  { %v603_v56 = vmax.f32 %v601_v42, %v602_v50  ;;  %v608_v57 = vrot.slane %v607_v51, 1  ;;  %v613_v58 = vmax.f32 %v611_v45, %v612_v52  ;;  %v618_v59 = vrot.slane %v617_v53, 2 }
 0x23f   :  { %2224 = vpow2.f32 %v632_v54  ;;  %v636_v60 = vmul.f32 1.442695, %v625_v55 }
 0x240   :  { %v626_v61 = vsub.f32 %v567_v10, %v603_v56  ;;  %v609_v62 = vmax.f32 %v607_v51, %v608_v57  ;;  %v614_v63 = vrot.slane %v613_v58, 1  ;;  %v619_v2 = vmax.f32 %v617_v53, %v618_v59 }
 0x241   :  { %2226 = vpow2.f32 %v636_v60 }
 0x242   :  { %v638_v1 = vmul.f32 1.442695, %v626_v61  ;;  %v627_v3 = vsub.f32 %v569_v17, %v609_v62  ;;  %v615_v4 = vmax.f32 %v613_v58, %v614_v63  ;;  %v620_v6 = vrot.slane %v619_v2, 1 }
 0x244   :  { %2228 = vpow2.f32 %v638_v1  ;;  %v640_v7 = vmul.f32 1.442695, %v627_v3  ;;  %v628_v8 = vsub.f32 %v571_v28, %v615_v4  ;;  %v621_v9 = vmax.f32 %v619_v2, %v620_v6 }
 0x245   :  { %v2786_v5 = vpop.eup %2220 }
 0x246   :  { %v646_v12 = vrot.slane %v2786_v5, 4  ;;  %2230 = vpow2.f32 %v640_v7  ;;  %v642_v13 = vmul.f32 1.442695, %v628_v8  ;;  %v629_v14 = vsub.f32 %v573_v36, %v621_v9 }
 0x247   :  { %v2789_v10 = vpop.eup %2222  ;;  %v710_v7 = vunpack.c.l.bf16 %v2739_v11 }
 0x248   :  { %v647_v15 = vadd.f32 %v2786_v5, %v646_v12  ;;  %v658_v16 = vrot.slane %v2789_v10, 4  ;;  %2232 = vpow2.f32 %v642_v13  ;;  %v644_v17 = vmul.f32 1.442695, %v629_v14 }
 0x249   :  { %v2793_v18 = vpop.eup %2224  ;;  %v712_v14 = vunpack.c.l.bf16 %v2744_v19 }
 0x24a   :  { %v648_v21 = vrot.slane %v647_v15, 2  ;;  %v659_v23 = vadd.f32 %v2789_v10, %v658_v16  ;;  %v652_v24 = vrot.slane %v2793_v18, 4  ;;  %2234 = vpow2.f32 %v644_v17 }
 0x24b   :  { %v2797_v25 = vpop.eup %2226 }
 0x24c   :  { %v649_v26 = vadd.f32 %v648_v21, %v647_v15  ;;  %v660_v28 = vrot.slane %v659_v23, 2  ;;  %v653_v29 = vadd.f32 %v2793_v18, %v652_v24  ;;  %v664_v30 = vrot.slane %v2797_v25, 4 }
 0x24e   :  { %v2801_v31 = vpop.eup %2228  ;;  %v650_v32 = vrot.slane %v649_v26, 1  ;;  %v661_v33 = vadd.f32 %v660_v28, %v659_v23  ;;  %v654_v34 = vrot.slane %v653_v29, 2  ;;  %v665_v35 = vadd.f32 %v2797_v25, %v664_v30 }
 0x24f   :  { %v670_v36 = vrot.slane %v2801_v31, 4  ;;  %v711_v23 = vunpack.c.h.bf16 %v2739_v11  ;;  %v713_v30 = vunpack.c.h.bf16 %v2744_v19  ;;  %v714_v11 = vunpack.c.l.bf16 %v2747_v20 }
 0x250   :  { %v2805_v38 = vpop.eup %2230  ;;  %v651_v39 = vadd.f32 %v650_v32, %v649_v26  ;;  %v662_v40 = vrot.slane %v661_v33, 1  ;;  %v655_v41 = vadd.f32 %v654_v34, %v653_v29  ;;  %v666_v42 = vrot.slane %v665_v35, 2 }
 0x251   :  { %v671_v44 = vadd.f32 %v2801_v31, %v670_v36  ;;  %v676_v45 = vrot.slane %v2805_v38, 4  ;;  %v715_v19 = vunpack.c.h.bf16 %v2747_v20 }
 0x252   :  { %v2809_v46 = vpop.eup %2232  ;;  %2236 = vrcp.f32 %v651_v39  ;;  %v663_v47 = vadd.f32 %v662_v40, %v661_v33  ;;  %v656_v48 = vrot.slane %v655_v41, 1  ;;  %v667_v49 = vadd.f32 %v666_v42, %v665_v35 }
 0x253   :  { %v672_v50 = vrot.slane %v671_v44, 2  ;;  %v677_v51 = vadd.f32 %v2805_v38, %v676_v45  ;;  %v682_v52 = vrot.slane %v2809_v46, 4 }
 0x254   :  { %v2813_v53 = vpop.eup %2234  ;;  %2238 = vrcp.f32 %v663_v47  ;;  %v657_v54 = vadd.f32 %v656_v48, %v655_v41  ;;  %v668_v55 = vrot.slane %v667_v49, 1 }
 0x255   :  { %v673_v56 = vadd.f32 %v672_v50, %v671_v44  ;;  %v678_v57 = vrot.slane %v677_v51, 2  ;;  %v683_v58 = vadd.f32 %v2809_v46, %v682_v52  ;;  %v688_v59 = vrot.slane %v2813_v53, 4 }
 0x256   :  { %2240 = vrcp.f32 %v657_v54  ;;  %v669_v60 = vadd.f32 %v668_v55, %v667_v49 }
 0x257   :  { %v674_v61 = vrot.slane %v673_v56, 1  ;;  %v679_v62 = vadd.f32 %v678_v57, %v677_v51  ;;  %v684_v63 = vrot.slane %v683_v58, 2  ;;  %v689_v2 = vadd.f32 %v2813_v53, %v688_v59 }
 0x258   :  { %2242 = vrcp.f32 %v669_v60  ;;  %v717_v60 = vunpack.c.h.bf16 %v2750_v22 }
 0x259   :  { %v675_v1 = vadd.f32 %v674_v61, %v673_v56  ;;  %v680_v3 = vrot.slane %v679_v62, 1  ;;  %v685_v4 = vadd.f32 %v684_v63, %v683_v58  ;;  %v690_v6 = vrot.slane %v689_v2, 2 }
 0x25b   :  { %2244 = vrcp.f32 %v675_v1  ;;  %v681_v8 = vadd.f32 %v680_v3, %v679_v62  ;;  %v686_v9 = vrot.slane %v685_v4, 1  ;;  %v691_v12 = vadd.f32 %v690_v6, %v689_v2 }
 0x25c   :  { %v2237_v13 = vpop.eup %2236 }
 0x25d   :  { %v702_v15 = vmul.f32 %v2237_v13, %v2786_v5  ;;  %2246 = vrcp.f32 %v681_v8  ;;  %v687_v16 = vadd.f32 %v686_v9, %v685_v4  ;;  %v692_v17 = vrot.slane %v691_v12, 1 }
 0x25e   :  { %v2239_v21 = vpop.eup %2238 }
 0x25f   :  { %v718_v24 = vmul.f32 %v710_v7, %v702_v15  ;;  %v704_v26 = vmul.f32 %v2239_v21, %v2789_v10  ;;  %2248 = vrcp.f32 %v687_v16  ;;  %v693_v28 = vadd.f32 %v692_v17, %v691_v12 }
 0x260   :  { %v2241_v29 = vpop.eup %2240 }
 0x261   :  { %v703_v32 = vmul.f32 %v2241_v29, %v2793_v18  ;;  %2250 = vrcp.f32 %v693_v28  ;;  %v720_v33 = vmul.f32 %v712_v14, %v704_v26  ;;  %v726_v34 = vrot.slane %v718_v24, 4 }
 0x262   :  { %v2243_v5 = vpop.eup %2242 }
 0x263   :  { %v719_v35 = vmul.f32 %v711_v23, %v703_v32  ;;  %v705_v36 = vmul.f32 %v2243_v5, %v2797_v25  ;;  %v727_v39 = vadd.f32 %v726_v34, %v718_v24  ;;  %v738_v40 = vrot.slane %v720_v33, 4 }
 0x264   :  { %v716_v25 = vunpack.c.l.bf16 %v2750_v22 }
 0x265   :  { %v2245_v41 = vpop.eup %2244  ;;  %v721_v10 = vmul.f32 %v713_v30, %v705_v36  ;;  %v728_v42 = vrot.slane %v727_v39, 2  ;;  %v732_v44 = vrot.slane %v719_v35, 4  ;;  %v739_v45 = vadd.f32 %v738_v40, %v720_v33 }
 0x266   :  { %v706_v18 = vmul.f32 %v2245_v41, %v2801_v31 }
 0x267   :  { %v2247_v47 = vpop.eup %2246  ;;  %v729_v48 = vadd.f32 %v728_v42, %v727_v39  ;;  %v733_v49 = vadd.f32 %v732_v44, %v719_v35  ;;  %v740_v50 = vrot.slane %v739_v45, 2  ;;  %v744_v51 = vrot.slane %v721_v10, 4 }
 0x268   :  { %v707_v52 = vmul.f32 %v2247_v47, %v2805_v38  ;;  %v722_v54 = vmul.f32 %v714_v11, %v706_v18 }
 0x269   :  { %v2249_v55 = vpop.eup %2248  ;;  %v730_v56 = vrot.slane %v729_v48, 1  ;;  %v734_v57 = vrot.slane %v733_v49, 2  ;;  %v741_v58 = vadd.f32 %v740_v50, %v739_v45  ;;  %v745_v59 = vadd.f32 %v744_v51, %v721_v10 }
 0x26a   :  { %v708_v20 = vmul.f32 %v2249_v55, %v2809_v46  ;;  %v723_v31 = vmul.f32 %v715_v19, %v707_v52  ;;  %v750_v61 = vrot.slane %v722_v54, 4 }
 0x26b   :  { %v2251_v62 = vpop.eup %2250  ;;  %v731_v63 = vadd.f32 %v730_v56, %v729_v48  ;;  %v735_v2 = vadd.f32 %v734_v57, %v733_v49  ;;  %v742_v1 = vrot.slane %v741_v58, 1  ;;  %v746_v3 = vrot.slane %v745_v59, 2 }
 0x26c   :  { %v709_v4 = vmul.f32 %v2251_v62, %v2813_v53  ;;  %v724_v38 = vmul.f32 %v716_v25, %v708_v20  ;;  %v751_v6 = vadd.f32 %v750_v61, %v722_v54  ;;  %v756_v7 = vrot.slane %v723_v31, 4  ;;  %v2128_v61 = vld [vmem:[#allocation15] ss:$12 sps:$4 sm:$0xff]  }
 0x26d   :  { %v736_v8 = vrot.slane %v735_v2, 1  ;;  %v743_v9 = vadd.f32 %v742_v1, %v741_v58  ;;  %v747_v12 = vadd.f32 %v746_v3, %v745_v59  ;;  %v774_v17 = vpack.c.bf16 %v731_v63, %v731_v63  ;;  %v2131_v63 = vld [vmem:[#allocation15 + $0x8] ss:$12 sps:$4 sm:$0xff]   ;;  %v2132_v3 = vld [vmem:[#allocation15 + $0x18] ss:$12 sps:$4 sm:$0xff]  }
 0x26e   :  { %v725_v13 = vmul.f32 %v717_v60, %v709_v4  ;;  %v752_v14 = vrot.slane %v751_v6, 2  ;;  %v757_v22 = vadd.f32 %v756_v7, %v723_v31  ;;  %v762_v15 = vrot.slane %v724_v38, 4  ;;  %v2134_v1 = vld [vmem:[#allocation15 + $0x1c] ss:$12 sps:$4 sm:$0xff]   ;;  %v2135_v4 = vld [vmem:[#allocation15 + $0x20] ss:$12 sps:$4 sm:$0xff]  }
 0x26f   :  { %v737_v46 = vadd.f32 %v736_v8, %v735_v2  ;;  %v748_v16 = vrot.slane %v747_v12, 1  ;;  %v776_v53 = vpack.c.bf16 %v743_v9, %v743_v9  ;;  %v839_v35 = vunpack.c.l.b16 %v774_v17  ;;  %v2139_v7 = vld [vmem:[#allocation15 + $0x38] ss:$12 sps:$4 sm:$0xff]   ;;  %v2140_v9 = vld [vmem:[#allocation15 + $0x48] ss:$12 sps:$4 sm:$0xff]  }
 0x270   :  { %v753_v21 = vadd.f32 %v752_v14, %v751_v6  ;;  %v758_v23 = vrot.slane %v757_v22, 2  ;;  %v763_v24 = vadd.f32 %v762_v15, %v724_v38  ;;  %v768_v26 = vrot.slane %v725_v13, 4  ;;  %v2138_v38 = vld [vmem:[#allocation15 + $0x34] ss:$12 sps:$4 sm:$0xff]   ;;  %v2136_v6 = vld [vmem:[#allocation15 + $0x30] ss:$12 sps:$4 sm:$0xff]  }
 0x271   :  { %v749_v28 = vadd.f32 %v748_v16, %v747_v12  ;;  %v775_v29 = vpack.c.bf16 %v737_v46, %v737_v46  ;;  %v841_v10 = vunpack.c.l.b16 %v776_v53  ;;  %v2142_v8 = vld [vmem:[#allocation15 + $0x4c] ss:$12 sps:$4 sm:$0xff]   ;;  %v2143_v12 = vld [vmem:[#allocation15 + $0x50] ss:$12 sps:$4 sm:$0xff]   ;;  %v2154_v17 = vld [vmem:[#allocation15 + $0x94] ss:$12 sps:$4 sm:$0xff]  }
 0x272   :  { %v754_v30 = vrot.slane %v753_v21, 1  ;;  %v759_v32 = vadd.f32 %v758_v23, %v757_v22  ;;  %v764_v33 = vrot.slane %v763_v24, 2  ;;  %v769_v34 = vadd.f32 %v768_v26, %v725_v13  ;;  %v2146_v13 = vld [vmem:[#allocation15 + $0x64] ss:$12 sps:$4 sm:$0xff]   ;;  %v2144_v14 = vld [vmem:[#allocation15 + $0x60] ss:$12 sps:$4 sm:$0xff]  }
 0x273   :  { %v777_v5 = vpack.c.bf16 %v749_v28, %v749_v28  ;;  %v840_v36 = vunpack.c.l.b16 %v775_v29  ;;  %v2147_v22 = vld [vmem:[#allocation15 + $0x68] ss:$12 sps:$4 sm:$0xff]   ;;  %v2148_v46 = vld [vmem:[#allocation15 + $0x78] ss:$12 sps:$4 sm:$0xff]   ;;  %v2151_v16 = vld [vmem:[#allocation15 + $0x80] ss:$12 sps:$4 sm:$0xff]  }
 0x274   :  { %v755_v39 = vadd.f32 %v754_v30, %v753_v21  ;;  %v760_v40 = vrot.slane %v759_v32, 1  ;;  %v765_v11 = vadd.f32 %v764_v33, %v763_v24  ;;  %v770_v41 = vrot.slane %v769_v34, 2  ;;  %v2150_v15 = vld [vmem:[#allocation15 + $0x7c] ss:$12 sps:$4 sm:$0xff]   ;;  %v2155_v23 = vld [vmem:[#allocation15 + $0x98] ss:$12 sps:$4 sm:$0xff]  }
 0x275   :  { %v842_v42 = vunpack.c.l.b16 %v777_v5  ;;  %v848_v44 = vsel %vm847_vm1, %v840_v36, %v839_v35  ;;  %v2152_v21 = vld [vmem:[#allocation15 + $0x90] ss:$12 sps:$4 sm:$0xff]   ;;  %v2158_v24 = vld [vmem:[#allocation15 + $0xac] ss:$12 sps:$4 sm:$0xff]   ;;  %v2156_v26 = vld [vmem:[#allocation15 + $0xa8] ss:$12 sps:$4 sm:$0xff]  }
 0x276   :  { %v761_v45 = vadd.f32 %v760_v40, %v759_v32  ;;  %v766_v19 = vrot.slane %v765_v11, 1  ;;  %v771_v18 = vadd.f32 %v770_v41, %v769_v34  ;;  %v778_v47 = vpack.c.bf16 %v755_v39, %v755_v39  ;;  %v2159_v28 = vld [vmem:[#allocation15 + $0xb0] ss:$12 sps:$4 sm:$0xff]   ;;  %v1078_v53 = vld [vmem:[%s2922_s12] sm:$0xf] }
 0x277   :  { %v850_v48 = vsel %vm849_vm2, %v841_v10, %v848_v44  ;;  %v2162_v29 = vld [vmem:[#allocation12 + $0x4] ss:$12 sps:$4 sm:$0xff]   ;;  %v2160_v30 = vld [vmem:[#allocation12] ss:$12 sps:$4 sm:$0xff]   ;;  %v2181_v32 = vld [vmem:[#allocation12 + $0x8] ss:$12 sps:$4 sm:$0xff]  }
 0x278   :  { %v767_v49 = vadd.f32 %v766_v19, %v765_v11  ;;  %v772_v50 = vrot.slane %v771_v18, 1  ;;  %v779_v51 = vpack.c.bf16 %v761_v45, %v761_v45  ;;  %v843_v25 = vunpack.c.l.b16 %v778_v47  ;;  %v2165_v33 = vld [vmem:[#allocation12 + $0x1c] ss:$12 sps:$4 sm:$0xff]   ;;  %v2163_v34 = vld [vmem:[#allocation12 + $0x18] ss:$12 sps:$4 sm:$0xff]  }
 0x279   :  { %v852_v52 = vsel %vm851_vm3, %v842_v42, %v850_v48  ;;  %v2185_v5 = vld [vmem:[#allocation12 + $0x20] ss:$12 sps:$4 sm:$0xff]   ;;  %v2166_v36 = vld [vmem:[#allocation12 + $0x30] ss:$12 sps:$4 sm:$0xff]   ;;  %v2186_v39 = vld [vmem:[#allocation12 + $0x38] ss:$12 sps:$4 sm:$0xff]  }
 0x27a   :  { %v773_v54 = vadd.f32 %v772_v50, %v771_v18  ;;  %v780_v55 = vpack.c.bf16 %v767_v49, %v767_v49  ;;  %v844_v56 = vunpack.c.l.b16 %v779_v51  ;;  %v854_v57 = vsel %vm853_vm4, %v843_v25, %v852_v52  ;;  %v2168_v35 = vld [vmem:[#allocation12 + $0x34] ss:$12 sps:$4 sm:$0xff]   ;;  %v2171_v40 = vld [vmem:[#allocation12 + $0x4c] ss:$12 sps:$4 sm:$0xff]   ;;  %v2187_v41 = vld [vmem:[#allocation12 + $0x50] ss:$12 sps:$4 sm:$0xff]  }
 0x27b   :  { %v2169_v11 = vld [vmem:[#allocation12 + $0x48] ss:$12 sps:$4 sm:$0xff]   ;;  %v2174_v10 = vld [vmem:[#allocation12 + $0x64] ss:$12 sps:$4 sm:$0xff]   ;;  %v2189_v19 = vld [vmem:[#allocation12 + $0x80] ss:$12 sps:$4 sm:$0xff]  }
 0x27c   :  { %v781_v58 = vpack.c.bf16 %v773_v54, %v773_v54  ;;  %v845_v59 = vunpack.c.l.b16 %v780_v55  ;;  %v856_v60 = vsel %vm855_vm5, %v844_v56, %v854_v57  ;;  %v2188_v42 = vld [vmem:[#allocation12 + $0x68] ss:$12 sps:$4 sm:$0xff]   ;;  %v2175_v45 = vld [vmem:[#allocation12 + $0x78] ss:$12 sps:$4 sm:$0xff]   ;;  %v2178_v47 = vld [vmem:[#allocation12 + $0x90] ss:$12 sps:$4 sm:$0xff]  }
 0x27d   :  { %v2177_v44 = vld [vmem:[#allocation12 + $0x7c] ss:$12 sps:$4 sm:$0xff]   ;;  %v2180_v18 = vld [vmem:[#allocation12 + $0x94] ss:$12 sps:$4 sm:$0xff]   ;;  %v2190_v48 = vld [vmem:[#allocation12 + $0x98] ss:$12 sps:$4 sm:$0xff]  }
 0x27e   :  { %v846_v20 = vunpack.c.l.b16 %v781_v58  ;;  %v858_v31 = vsel %vm857_vm6, %v845_v59, %v856_v60  ;;  %v2184_v49 = vld [vmem:[#allocation12 + $0xac] ss:$12 sps:$4 sm:$0xff]   ;;  %v2182_v50 = vld [vmem:[#allocation12 + $0xa8] ss:$12 sps:$4 sm:$0xff]   ;;  %v2191_v25 = vld [vmem:[#allocation12 + $0xb0] ss:$12 sps:$4 sm:$0xff]  }
 0x27f   :  { %v2857_v51 = vld [vmem:[#allocation6] sm:$0xff]  ;;  %v2192_v54 = vld [vmem:[#allocation14] sm:$0xff]   ;;  %v2193_v55 = vld [vmem:[#allocation14 + $0x8] sm:$0xff]  }
 0x280   :  { %v860_v62 = vsel %vm859_vm7, %v846_v20, %v858_v31  ;;  %v1333_v52 = vpack.c.bf16 %v2857_v51, %v2857_v51  ;;  %v2194_v56 = vld [vmem:[#allocation14 + $0x10] sm:$0xff]   ;;  %v2195_v57 = vld [vmem:[#allocation14 + $0x18] sm:$0xff]   ;;  %v2196_v58 = vld [vmem:[#allocation14 + $0x20] sm:$0xff]  }
 0x281   :  { %v861_v2 = vpack.c.b16 %v860_v62, %v860_v62  ;;  %v2197_v59 = vld [vmem:[#allocation14 + $0x28] sm:$0xff]   ;;  %v2198_v60 = vld [vmem:[#allocation14 + $0x30] sm:$0xff]   ;;  %v2199_v20 = vld [vmem:[#allocation14 + $0x38] sm:$0xff]  }
 0x283   :  { %1024 = vmatmul.mubr.bf16.vlgmr.msra.gmra.mrb[4].mxu0 %v861_v2  ;;  %1983 = vmatmul.mubr.bf16.vlgmr.msra.gmra.mrb[8].mxu1 %v861_v2  ;;  %v826_v2 = vsub.s32 2, %v2757_v27 }
 0x284   :  { %1240 = vmatpush1.bf16.msra.mxu0 %v2128_v61  ;;  %1987 = vmatpush3.bf16.msra.mxu1 %v2131_v63 }
 0x285   :  { %1241 = vmatprep.subr.bf16.mxu0 %v2134_v1  ;;  %1988 = vmatprep.subr.bf16.mxu1 %v2508_v0  ;;  %v814_v1 = vld [vmem:[%s2918_s8] sm:$0x7]  ;;  %s2512_s8 = smov [#allocation17]  }
 0x286   :  { %2002 = vmatprep.mubr.msk.bf16.mxu1 %vm2509_vm0, %v2508_v0  ;;  %1271 = vmatprep.mubr.bf16.mxu0 %v2511_v43 }
 0x288   :  { %1242 = vmatpush1.bf16.msra.mxu0 %v2132_v3  ;;  %1989 = vmatpush3.bf16.msra.mxu1 %v2135_v4  ;;  %v827_v3 = vrot.slane %v814_v1, %v826_v2 }
 0x289   :  { %1243 = vmatprep.subr.bf16.mxu0 %v2138_v38  ;;  %1990 = vmatprep.subr.bf16.mxu1 %v2508_v0 }
 0x28c   :  { %1244 = vmatpush1.bf16.msra.mxu0 %v2136_v6  ;;  %1991 = vmatpush3.bf16.msra.mxu1 %v2139_v7 }
 0x28d   :  { %1245 = vmatprep.subr.bf16.mxu0 %v2142_v8  ;;  %1992 = vmatprep.subr.bf16.mxu1 %v2508_v0 }
 0x290   :  { %1246 = vmatpush1.bf16.msra.mxu0 %v2140_v9  ;;  %1993 = vmatpush3.bf16.msra.mxu1 %v2143_v12  ;;  %v822_v12 = vsub.s32 1, %v2757_v27 }
 0x291   :  { %1247 = vmatprep.subr.bf16.mxu0 %v2146_v13  ;;  %1994 = vmatprep.subr.bf16.mxu1 %v2508_v0  ;;  %v819_v13 = vrot.slane %v814_v1, %v2764_v37 }
 0x294   :  { %1248 = vmatpush1.bf16.msra.mxu0 %v2144_v14  ;;  %1995 = vmatpush3.bf16.msra.mxu1 %v2147_v22  ;;  %v823_v22 = vrot.slane %v814_v1, %v822_v12 }
 0x295   :  { %1249 = vmatprep.subr.bf16.mxu0 %v2150_v15  ;;  %1996 = vmatprep.subr.bf16.mxu1 %v2508_v0 }
 0x298   :  { %1250 = vmatpush1.bf16.msra.mxu0 %v2148_v46  ;;  %1997 = vmatpush3.bf16.msra.mxu1 %v2151_v16 }
 0x299   :  { %1251 = vmatprep.subr.bf16.mxu0 %v2154_v17  ;;  %1998 = vmatprep.subr.bf16.mxu1 %v2508_v0 }
 0x29c   :  { %1252 = vmatpush1.bf16.msra.mxu0 %v2152_v21  ;;  %1999 = vmatpush3.bf16.msra.mxu1 %v2155_v23 }
 0x29d   :  { %1253 = vmatprep.subr.bf16.mxu0 %v2158_v24  ;;  %2000 = vmatprep.subr.bf16.mxu1 %v2508_v0 }
 0x2a0   :  { %1254 = vmatpush1.bf16.msra.mxu0 %v2156_v26  ;;  %2001 = vmatpush3.bf16.msra.mxu1 %v2159_v28 }
 0x2a1   :  { %1511 = vmatprep.subr.bf16.mxu0 %v2162_v29  ;;  %2006 = vmatprep.subr.bf16.mxu1 %v2508_v0 }
 0x2a3   :  { %2003 = vmatmul.mubr.bf16.vlgmr.msra.gmra.mrb[12].mxu1 %v1078_v53  ;;  %1272 = vmatmul.mubr.bf16.vlgmr.msra.gmra.mrb[4].mxu0 %v1078_v53 }
 0x2a4   :  { %1512 = vmatpush1.bf16.msra.mxu0 %v2160_v30  ;;  %2007 = vmatpush3.bf16.msra.mxu1 %v2181_v32 }
 0x2a5   :  { %1513 = vmatprep.subr.bf16.mxu0 %v2165_v33  ;;  %2008 = vmatprep.subr.bf16.mxu1 %v2508_v0 }
 0x2a6   :  { %1543 = vmatprep.mubr.bf16.mxu0 %v2511_v43  ;;  %2022 = vmatprep.mubr.msk.bf16.mxu1 %vm2509_vm0, %v2508_v0  ;;  %v2172_v43 = vld [vmem:[#allocation12 + $0x60] ss:$12 sps:$4 sm:$0xff]  }
 0x2a8   :  { %1514 = vmatpush1.bf16.msra.mxu0 %v2163_v34  ;;  %2009 = vmatpush3.bf16.msra.mxu1 %v2185_v5 }
 0x2a9   :  { %1515 = vmatprep.subr.bf16.mxu0 %v2168_v35  ;;  %2010 = vmatprep.subr.bf16.mxu1 %v2508_v0 }
 0x2ac   :  { %1516 = vmatpush1.bf16.msra.mxu0 %v2166_v36  ;;  %2011 = vmatpush3.bf16.msra.mxu1 %v2186_v39 }
 0x2ad   :  { %1517 = vmatprep.subr.bf16.mxu0 %v2171_v40  ;;  %2012 = vmatprep.subr.bf16.mxu1 %v2508_v0 }
 0x2b0   :  { %1518 = vmatpush1.bf16.msra.mxu0 %v2169_v11  ;;  %2013 = vmatpush3.bf16.msra.mxu1 %v2187_v41 }
 0x2b1   :  { %1519 = vmatprep.subr.bf16.mxu0 %v2174_v10  ;;  %2014 = vmatprep.subr.bf16.mxu1 %v2508_v0 }
 0x2b4   :  { %1520 = vmatpush1.bf16.msra.mxu0 %v2172_v43  ;;  %2015 = vmatpush3.bf16.msra.mxu1 %v2188_v42 }
 0x2b5   :  { %1521 = vmatprep.subr.bf16.mxu0 %v2177_v44  ;;  %2016 = vmatprep.subr.bf16.mxu1 %v2508_v0 }
 0x2b8   :  { %1522 = vmatpush1.bf16.msra.mxu0 %v2175_v45  ;;  %2017 = vmatpush3.bf16.msra.mxu1 %v2189_v19 }
 0x2b9   :  { %1523 = vmatprep.subr.bf16.mxu0 %v2180_v18  ;;  %2018 = vmatprep.subr.bf16.mxu1 %v2508_v0 }
 0x2bc   :  { %1524 = vmatpush1.bf16.msra.mxu0 %v2178_v47  ;;  %2019 = vmatpush3.bf16.msra.mxu1 %v2190_v48 }
 0x2bd   :  { %1525 = vmatprep.subr.bf16.mxu0 %v2184_v49  ;;  %2020 = vmatprep.subr.bf16.mxu1 %v2508_v0 }
 0x2c0   :  { %1526 = vmatpush1.bf16.msra.mxu0 %v2182_v50  ;;  %2021 = vmatpush3.bf16.msra.mxu1 %v2191_v25 }
 0x2c1   :  { %2026 = vmatprep.subr.bf16.mxu0 %v2508_v0 }
 0x2c3   :  { %1544 = vmatmul.mubr.bf16.vlgmr.msra.gmra.mrb[4].mxu0 %v1333_v52  ;;  %2023 = vmatmul.mubr.bf16.vlgmr.msra.gmra.mrb[16].mxu1 %v1333_v52 }
 0x2c4   :  { %2042 = vmatprep.mubr.msk.bf16.mxu0 %vm2509_vm0, %v2508_v0  ;;  %2027 = vmatpush3.bf16.msra.mxu0 %v2192_v54 }
 0x2c5   :  { %2028 = vmatprep.subr.bf16.mxu0 %v2508_v0 }
 0x2c8   :  { %2029 = vmatpush3.bf16.msra.mxu0 %v2193_v55 }
 0x2c9   :  { %2030 = vmatprep.subr.bf16.mxu0 %v2508_v0 }
 0x2cc   :  { %2031 = vmatpush3.bf16.msra.mxu0 %v2194_v56 }
 0x2cd   :  { %2032 = vmatprep.subr.bf16.mxu0 %v2508_v0 }
 0x2d0   :  { %2033 = vmatpush3.bf16.msra.mxu0 %v2195_v57 }
 0x2d1   :  { %2034 = vmatprep.subr.bf16.mxu0 %v2508_v0 }
 0x2d4   :  { %2035 = vmatpush3.bf16.msra.mxu0 %v2196_v58 }
 0x2d5   :  { %2036 = vmatprep.subr.bf16.mxu0 %v2508_v0 }
 0x2d8   :  { %2037 = vmatpush3.bf16.msra.mxu0 %v2197_v59 }
 0x2d9   :  { %2038 = vmatprep.subr.bf16.mxu0 %v2508_v0 }
 0x2dc   :  { %2039 = vmatpush3.bf16.msra.mxu0 %v2198_v60 }
 0x2dd   :  { %2040 = vmatprep.subr.bf16.mxu0 %v2508_v0  ;;  %v1366_v0 = vld [vmem:[%s2919_s9] sm:$0x7]  ;;  %s1733_s9 = sshll.u32 %s2512_s8, 4  ;;  %s1734_s9 = int_to_ptr.vmem [resolvable:$true] %s1733_s9 }
 0x2de   :  { %v1371_v14 = vrot.slane %v1366_v0, %v2764_v37  ;;  %v1375_v15 = vrot.slane %v1366_v0, %v822_v12  ;;  %v1379_v5 = vrot.slane %v1366_v0, %v826_v2  ;;  %s2438_s18 = scalar_lea.vmem %s1734_s9, 128  ;;  %p2443_p9 = scmp.lt.s32.totalorder %s1734_s9, %s1734_s9 }
 0x2df   :  { %p2439_p8 = scmp.ne.s32.totalorder %s1734_s9, %s2438_s18  ;;  %p2444_p10 = scmp.lt.s32.totalorder %s2438_s18, %s2438_s18 }
 0x2e0   :  { %2041 = vmatpush3.bf16.msra.mxu0 %v2199_v20  ;;  %v2046_v46 = vadd.f32 %v1371_v14, %v819_v13  ;;  %v2048_v17 = vadd.f32 %v1375_v15, %v823_v22 }
 0x2e1   :  { %p2445_p11 = por %p2444_p10, %p2443_p9 }
 0x2e3   :  { %p2446_p12 = pnand %p2445_p11, %p2439_p8 }
 0x356   :  { %v1066_v31 = vpop.f32.mrb[8].mxu1 }
 0x357   :  { %v1984_v61 = vpop.f32.mrb[9].mxu1  ;;  %v1067_v4 = vadd.f32 %v1066_v31, %v827_v3 }
 0x358   :  { %v1069_v62 = vpop.f32.mrb[10].mxu1 }
 0x359   :  { %v1985_v63 = vpop.f32.mrb[11].mxu1 }
 0x376   :  { %v1314_v38 = vpop.f32.mrb[12].mxu1 }
 0x377   :  { %v1322_v6 = vadd.f32 %v1314_v38, %v1067_v4  ;;  %v2004_v7 = vpop.f32.mrb[13].mxu1 }
 0x378   :  { %v1317_v8 = vpop.f32.mrb[14].mxu1 }
 0x379   :  { %v2005_v9 = vpop.f32.mrb[15].mxu1 }
 0x396   :  { %v1545_v16 = vpop.f32.mrb[4].mxu0  ;;  %v1586_v21 = vpop.f32.mrb[16].mxu1 }
 0x397   :  { %v2047_v23 = vadd.f32 %v2046_v46, %v1545_v16  ;;  %v1547_v24 = vpop.f32.mrb[5].mxu0  ;;  %v2024_v26 = vpop.f32.mrb[17].mxu1  ;;  %v1587_v39 = vadd.f32 %v1586_v21, %v1379_v5 }
 0x398   :  { %v1549_v28 = vpop.f32.mrb[6].mxu0  ;;  %v1589_v29 = vpop.f32.mrb[18].mxu1  ;;  %v2049_v33 = vadd.f32 %v2048_v17, %v1547_v24 }
 0x399   :  { %v1854_v53 = vmul.f32 -1.442695, %v2047_v23  ;;  %v1550_v30 = vpop.f32.mrb[7].mxu0  ;;  %v2025_v32 = vpop.f32.mrb[19].mxu1 }
 0x39a   :  { %v1855_v27 = vmul.f32 -1.442695, %v2049_v33 }
 0x39b   :  { %2252 = vpow2.f32 %v1854_v53 }
 0x39c   :  { %2254 = vpow2.f32 %v1855_v27 }
 0x3a5   :  { %v2253_v34 = vpop.eup %2252 }
 0x3a6   :  { %v1596_v37 = vadd.f32 1.0, %v2253_v34  ;;  %v2255_v35 = vpop.eup %2254 }
 0x3a7   :  { %v1603_v36 = vadd.f32 1.0, %v2255_v35 }
 0x3a8   :  { %2256 = vrcp.f32 %v1596_v37 }
 0x3a9   :  { %2258 = vrcp.f32 %v1603_v36 }
 0x3b2   :  { %v2257_v40 = vpop.eup %2256 }
 0x3b3   :  { %v1606_v11 = vmul.f32 %v2257_v40, %v1587_v39  ;;  %v2259_v10 = vpop.eup %2258 }
 0x3b4   :  { %v1609_v43 = vsub.f32 1.0, %v2259_v10  ;;  %v1611_v45 = vmul.f32 %v2259_v10, %v2857_v51 }
 0x3b5   :  { %v1607_v41 = vadd.f32 %v1606_v11, %v1322_v6 }
 0x3b7   :  { %2260 = vtanh.f32 %v1607_v41 }
 0x3c1   :  { %v2261_v42 = vpop.eup %2260 }
 0x3c2   :  { %v1610_v44 = vmul.f32 %v2261_v42, %v1609_v43 }
 0x3c4   :  { %v1612_v19 = vadd.f32 %v1611_v45, %v1610_v44 }
 0x3c6   :  { %v1614_v18 = vpack.c.bf16 %v1612_v19, %v1612_v19  ;;  %1613 = vst [vmem:[#allocation17] sm:$0xff] %v1612_v19 }
 0x3c8   :  { %2043 = vmatmul.mubr.bf16.vlgmr.msra.gmra.mrb[8].mxu0 %v1614_v18 }
 0x3c9   :  { %2449 = shalt.err (!%p2446_p12)
}
 0x3ca   :  { %s2450_s6 = scalar_lea.hbm %s2924_s14, 128 }
 0x3cb   :  { %p2451_p13 = scmp.ne.s32.totalorder %s2924_s14, %s2450_s6  ;;  %p2454_p0 = scmp.lt.u32.totalorder %s2450_s6, %s2924_s14 }
 0x3cd   :  { %p2456_p1 = pnand %p2454_p0, %p2451_p13 }
 0x3cf   :  { %2459 = shalt.err (!%p2456_p1)
}
 0x3d0   :  { %1736 = dma.vmem_to_hbm [thread:$0]  %s1734_s9, 128, %s2924_s14, [#allocation5]   ;;  %v1856_v47 = vld [vmem:[%s2921_s11] ss:$0 sm:$0xff] }
 0x3d1   :  { %s2513_s29 = smov [#allocation18]  }
 0x3d2   :  { %s1743_s3 = sshll.u32 %s2513_s29, 4  ;;  %s1744_s3 = int_to_ptr.vmem [resolvable:$true] %s1743_s3 }
 0x3d3   :  { %s2460_s10 = scalar_lea.vmem %s1744_s3, 128  ;;  %p2465_p3 = scmp.lt.s32.totalorder %s1744_s3, %s1744_s3 }
 0x3d4   :  { %p2461_p2 = scmp.ne.s32.totalorder %s1744_s3, %s2460_s10  ;;  %p2466_p4 = scmp.lt.s32.totalorder %s2460_s10, %s2460_s10 }
 0x3d6   :  { %p2467_p5 = por %p2466_p4, %p2465_p3 }
 0x3d8   :  { %p2468_p6 = pnand %p2467_p5, %p2461_p2 }
 0x49b   :  { %v1720_v48 = vpop.f32.mrb[8].mxu0 }
 0x49c   :  { %v1721_v49 = vadd.f32 %v1856_v47, %v1720_v48  ;;  %v2044_v50 = vpop.f32.mrb[9].mxu0 }
 0x49d   :  { %v1723_v51 = vpop.f32.mrb[10].mxu0 }
 0x49e   :  { %1726 = vst [vmem:[#allocation18] sm:$0xff] %v1721_v49  ;;  %v2045_v25 = vpop.f32.mrb[11].mxu0 }
 0x49f   :  { %2471 = shalt.err (!%p2468_p6)
}
 0x4a0   :  { %s2472_s11 = scalar_lea.hbm %s2925_s15, 128 }
 0x4a1   :  { %p2473_p7 = scmp.ne.s32.totalorder %s2925_s15, %s2472_s11  ;;  %p2476_p8 = scmp.lt.u32.totalorder %s2472_s11, %s2925_s15 }
 0x4a3   :  { %p2478_p9 = pnand %p2476_p8, %p2473_p7 }
 0x4a5   :  { %2481 = shalt.err (!%p2478_p9)
}
 0x4a6   :  { %1746 = dma.vmem_to_hbm [thread:$0]  %s1744_s3, 128, %s2925_s15, [#allocation19]  }
 0x4a7   :  { %2492 = dma.done.wait [#allocation5], 128  }
 0x4a8   :  { %2493 = vsyncadd [#allocation5], 4294967168 }
 0x4a9   :  { %2494 = dma.done.wait [#allocation19], 128  }
 0x4aa   :  { %2495 = vsyncadd [#allocation19], 4294967168 }
 0x4ab   :  { %1753 = vsyncpa [#allocation4], 1 }
 0x4ac   :  { %1754 = vsyncpa [#allocation7], 1 }
 0x4ad   :  { %1755 = vsyncpa [#allocation10], 1 }
 0x4ae   :  { %1756 = vsyncpa [#allocation13], 1 }
 0x4af   :  { %1757 = vsyncpa [#allocation16], 1 }
 0x4b0   :  { %1758 = vsyncpa [#allocation5], 1 }
 0x4b1   :  { %1759 = vsyncpa [#allocation19], 1 }

</bundles_post_ra>
